<compile_context>
chip_gen: v7x
topology: tpu7x:2x2x1
jax: 0.10.0
libtpu: 0.0.40
codegen_flags: <defaults>
</compile_context>

<pallas_src>
import jax
import jax.numpy as jnp
from jax import lax
from jax.experimental import pallas as pl
from jax.experimental.pallas import tpu as pltpu

_LANE = 128  # lane width / MXU alignment


def _round_up(x, m):
    return (x + m - 1) // m * m


def _pad2d(a, rows, cols):
    r, c = a.shape
    if r == rows and c == cols:
        return a
    return jnp.pad(a, ((0, rows - r), (0, cols - c)))


def _default_act_dtype():
    """bf16 inter-layer activations on bf16-VPU chips (v6e/v7x), f32 otherwise."""
    try:
        kind = jax.devices()[0].device_kind.lower()
    except Exception:
        return jnp.float32
    if "v6" in kind or "v7" in kind:
        return jnp.bfloat16
    return jnp.float32


def _make_kernel(n_embed, n_feat, n_clf, compute_dtype, act_dtype):
    """Fused MLP kernel.

    Parameter ref order (after embed_ref, feat_ref):
      embed tower:  n_embed x (W, b)
      feat tower:   n_feat  x (W, b)
      if n_clf >= 1: concat layer split (W_e, W_f, b), then (n_clf-1) x (W, b),
                     then head (W_head_T, b_head)
      if n_clf == 0: head split (W_head_e_T, W_head_f_T, b_head)
    """

    def kernel(embed_ref, feat_ref, *refs):
        out_ref = refs[-1]
        it = iter(refs[:-1])

        def dot(x, w_ref):
            # bf16 MXU inputs, f32 accumulation.
            return jnp.dot(x.astype(compute_dtype), w_ref[...],
                           preferred_element_type=jnp.float32)

        def dot_bt(w_ref, x):
            # (rows, K) @ (tile_b, K)^T  ->  (rows, tile_b), batch on lanes.
            return lax.dot_general(
                w_ref[...], x.astype(compute_dtype),
                dimension_numbers=(((1,), (1,)), ((), ())),
                preferred_element_type=jnp.float32)

        def linear(x, w_ref, b_ref, relu):
            y = dot(x, w_ref) + b_ref[...]
            if relu:
                y = jnp.maximum(y, 0.0)
            return y.astype(act_dtype)

        # Embed tower.
        y_e = embed_ref[...]
        for _ in range(n_embed):
            y_e = linear(y_e, next(it), next(it), relu=True)

        # Feat tower.
        y_f = feat_ref[...]
        for _ in range(n_feat):
            y_f = linear(y_f, next(it), next(it), relu=True)

        if n_clf >= 1:
            # Concat elimination: first clf layer as two partial matmuls summed
            # into one f32 accumulator (no lane-axis concatenate).
            w_e, w_f, b_c = next(it), next(it), next(it)
            vec = dot(y_e, w_e) + dot(y_f, w_f) + b_c[...]
            vec = jnp.maximum(vec, 0.0).astype(act_dtype)
            for _ in range(n_clf - 1):
                vec = linear(vec, next(it), next(it), relu=True)
            # Head: w_head (8, d_cat_p) @ vec^T -> (8, tile_b); row 0 is real.
            w_h, b_h = next(it), next(it)
            logits_t = dot_bt(w_h, vec)
        else:
            # Head IS the first post-concat layer: split across the two towers.
            w_he, w_hf, b_h = next(it), next(it), next(it)
            logits_t = dot_bt(w_he, y_e) + dot_bt(w_hf, y_f)

        # Lane-dense batch-on-lanes store: 4 bytes per batch row.
        out_ref[...] = (logits_t[0:1, :] + b_h[...]).astype(out_ref.dtype)

    return kernel


def _prepare_flat_params(params, compute_dtype):
    """Pad feature dims to lane multiples, split the first post-concat weight
    (concat elimination), transpose the head to (out, in) orientation, and cast
    weights to the MXU compute dtype (biases stay f32)."""
    embeds = list(params["embeds"])
    feats = list(params["feats"])
    clf = list(params["clf"])
    head_w, head_b = params["head"]          # (d_cat, 1), (1, 1)

    h_e = embeds[0][0].shape[1]
    h_f = feats[0][0].shape[1]
    h_e_p = _round_up(h_e, _LANE)
    h_f_p = _round_up(h_f, _LANE)
    d_cat_p = _round_up(h_e + h_f, _LANE)

    flat = []

    def add_w(w, rows, cols):
        flat.append(_pad2d(w, rows, cols).astype(compute_dtype))

    def add_b(b, cols):
        flat.append(_pad2d(b, 1, cols).astype(jnp.float32))

    # Embed tower (first layer keeps its true input dim; hidden dims padded).
    for li, (w, b) in enumerate(embeds):
        add_w(w, w.shape[0] if li == 0 else h_e_p, h_e_p)
        add_b(b, h_e_p)
    # Feat tower.
    for li, (w, b) in enumerate(feats):
        add_w(w, w.shape[0] if li == 0 else h_f_p, h_f_p)
        add_b(b, h_f_p)

    head_w_t = head_w.T                      # (1, d_cat), (out, in) orientation
    if clf:
        # First clf layer split row-wise (embed part / feat part).
        w0, b0 = clf[0]
        add_w(w0[:h_e, :], h_e_p, d_cat_p)
        add_w(w0[h_e:, :], h_f_p, d_cat_p)
        add_b(b0, d_cat_p)
        for w, b in clf[1:]:
            add_w(w, d_cat_p, d_cat_p)
            add_b(b, d_cat_p)
        # Head, (out, in) layout, out padded to 8 sublanes (row 0 real).
        flat.append(_pad2d(head_w_t, 8, d_cat_p).astype(compute_dtype))
    else:
        # Head is the first post-concat layer: split along its input dim.
        flat.append(_pad2d(head_w_t[:, :h_e], 8, h_e_p).astype(compute_dtype))
        flat.append(_pad2d(head_w_t[:, h_e:], 8, h_f_p).astype(compute_dtype))
    flat.append(head_b.reshape(1, 1).astype(jnp.float32))

    return flat, len(embeds), len(feats), len(clf)


def my_model_forward(embed, feat, params, *, tile_b=1024,
                     compute_dtype=jnp.bfloat16, act_dtype=None):
    """params: dict with lists of (W, b), W shaped (in, out), b shaped (1, out)."""
    if act_dtype is None:
        act_dtype = _default_act_dtype()

    batch, d_embed = embed.shape
    d_feat = feat.shape[1]

    flat, n_embed, n_feat_layers, n_clf = _prepare_flat_params(
        params, compute_dtype)

    # Batch tiling: large lane-aligned tiles (per-grid-step overhead ~0.35us);
    # tiny batches use one 128-row tile.  tile_b is always a multiple of 128 or
    # equal to the padded batch, so the lane-dense output store stays unmasked.
    tile_b = _round_up(max(int(tile_b), _LANE), _LANE)
    tile_b = min(tile_b, _round_up(batch, _LANE))
    b_pad = _round_up(batch, tile_b)

    # bf16 input staging (halves input DMA + VMEM tile bytes).
    # TODO(synk): in production, fuse this cast into the upstream producer.
    embed = embed.astype(compute_dtype)
    feat = feat.astype(compute_dtype)
    if b_pad != batch:
        embed = jnp.pad(embed, ((0, b_pad - batch), (0, 0)))
        feat = jnp.pad(feat, ((0, b_pad - batch), (0, 0)))

    grid = (b_pad // tile_b,)

    act_specs = [
        pl.BlockSpec((tile_b, d_embed), lambda i: (i, 0)),
        pl.BlockSpec((tile_b, d_feat), lambda i: (i, 0)),
    ]
    # Weights/biases: full-array blocks with constant index maps -> DMA'd once,
    # VMEM-resident across all batch tiles.
    w_specs = [pl.BlockSpec(a.shape, lambda i: (0, 0)) for a in flat]
    # Batch-on-lanes output row: (1, b_pad) f32, one (1, tile_b) block per step.
    out_spec = pl.BlockSpec((1, tile_b), lambda i: (0, i))

    # Explicit VMEM budget: 2x resident weights + double-buffered I/O tiles +
    # headroom for f32 intermediates; capped at 48 MiB (v7x has 64 MiB / TC).
    weight_bytes = sum(int(a.size) * a.dtype.itemsize for a in flat)
    in_tile_bytes = tile_b * (d_embed + d_feat) * 2
    out_tile_bytes = tile_b * 4
    max_width = max(int(a.shape[-1]) for a in flat)
    act_bytes = 6 * tile_b * max_width * 4
    budget = 2 * weight_bytes + 2 * (in_tile_bytes + out_tile_bytes) \
        + act_bytes + (8 << 20)
    vmem_limit = int(min(48 << 20, max(32 << 20, budget)))

    kernel = _make_kernel(n_embed, n_feat_layers, n_clf, compute_dtype,
                          act_dtype)

    out = pl.pallas_call(
        kernel,
        out_shape=jax.ShapeDtypeStruct((1, b_pad), jnp.float32),
        grid=grid,
        in_specs=act_specs + w_specs,
        out_specs=out_spec,
        compiler_params=pltpu.CompilerParams(
            dimension_semantics=("parallel",),
            vmem_limit_bytes=vmem_limit),
    )(embed, feat, *flat)

    # Contiguous slice of the real batch rows -> (batch, 1) logits.
    return {"logits": out[0, :batch].reshape(batch, 1)}


def init_params(key, d_embed, d_feat, d_hidden_embed, d_hidden_feat,
                n_hidden_embed, n_hidden_feat, n_clf):
    """Deterministic synthetic init mirroring the PyTorch module's shapes.
    Weights stored as (in, out); biases as (1, out)."""
    def make_linear(k, d_in, d_out):
        k_w, k_b = jax.random.split(k)
        scale = 1.0 / jnp.sqrt(jnp.float32(d_in))
        w = jax.random.uniform(k_w, (d_in, d_out), jnp.float32, -scale, scale)
        b = jax.random.uniform(k_b, (1, d_out), jnp.float32, -scale, scale)
        return w, b

    keys = jax.random.split(key, 64)
    ki = iter(range(64))

    embeds = [make_linear(keys[next(ki)], d_embed, d_hidden_embed)]
    for _ in range(n_hidden_embed):
        embeds.append(make_linear(keys[next(ki)], d_hidden_embed, d_hidden_embed))

    feats = [make_linear(keys[next(ki)], d_feat, d_hidden_feat)]
    for _ in range(n_hidden_feat):
        feats.append(make_linear(keys[next(ki)], d_hidden_feat, d_hidden_feat))

    d_cat = d_hidden_embed + d_hidden_feat
    clf = [make_linear(keys[next(ki)], d_cat, d_cat) for _ in range(n_clf)]
    head = make_linear(keys[next(ki)], d_cat, 1)

    return {"embeds": embeds, "feats": feats, "clf": clf, "head": head}


def reference_forward(embed, feat, params):
    """Pure-JAX f32 reference for validation (dropout = identity)."""
    y = embed
    for w, b in params["embeds"]:
        y = jnp.maximum(y @ w + b, 0.0)
    z = feat
    for w, b in params["feats"]:
        z = jnp.maximum(z @ w + b, 0.0)
    vec = jnp.concatenate([y, z], axis=-1)
    for w, b in params["clf"]:
        vec = jnp.maximum(vec @ w + b, 0.0)
    w, b = params["head"]
    return vec @ w + b


if __name__ == "__main__":
    # Small shapes consistent with the module's forward.
    batch = 8
    d_embed, d_feat = 32, 16
    d_hidden_embed, d_hidden_feat = 64, 64
    n_hidden_embed, n_hidden_feat, n_clf = 2, 2, 2

    key = jax.random.PRNGKey(0)
    k_p, k_e, k_f = jax.random.split(key, 3)

    params = init_params(k_p, d_embed, d_feat, d_hidden_embed, d_hidden_feat,
                         n_hidden_embed, n_hidden_feat, n_clf)

    embed = jax.random.normal(k_e, (batch, d_embed), jnp.float32)
    feat = jax.random.normal(k_f, (batch, d_feat), jnp.float32)

    out = my_model_forward(embed, feat, params)
    logits = jax.block_until_ready(out["logits"])

    ref = jax.block_until_ready(reference_forward(embed, feat, params))
    assert logits.shape == (batch, 1)
    # bf16 MXU inputs with f32 accumulation -> a few e-3 relative error vs f32.
    assert jnp.allclose(logits, ref, atol=5e-2, rtol=5e-2), \
        float(jnp.max(jnp.abs(logits - ref)))

    print("KERNEL_OK")
</pallas_src>

<mosaic_0001>
module attributes {stable_mosaic.version = 11 : i64} {
  func.func @kernel(%arg0: i32, %arg1: memref<128x32xbf16, #tpu.memory_space<vmem>>, %arg2: memref<128x16xbf16, #tpu.memory_space<vmem>>, %arg3: memref<32x128xbf16, #tpu.memory_space<vmem>>, %arg4: memref<1x128xf32, #tpu.memory_space<vmem>>, %arg5: memref<128x128xbf16, #tpu.memory_space<vmem>>, %arg6: memref<1x128xf32, #tpu.memory_space<vmem>>, %arg7: memref<128x128xbf16, #tpu.memory_space<vmem>>, %arg8: memref<1x128xf32, #tpu.memory_space<vmem>>, %arg9: memref<16x128xbf16, #tpu.memory_space<vmem>>, %arg10: memref<1x128xf32, #tpu.memory_space<vmem>>, %arg11: memref<128x128xbf16, #tpu.memory_space<vmem>>, %arg12: memref<1x128xf32, #tpu.memory_space<vmem>>, %arg13: memref<128x128xbf16, #tpu.memory_space<vmem>>, %arg14: memref<1x128xf32, #tpu.memory_space<vmem>>, %arg15: memref<128x128xbf16, #tpu.memory_space<vmem>>, %arg16: memref<128x128xbf16, #tpu.memory_space<vmem>>, %arg17: memref<1x128xf32, #tpu.memory_space<vmem>>, %arg18: memref<128x128xbf16, #tpu.memory_space<vmem>>, %arg19: memref<1x128xf32, #tpu.memory_space<vmem>>, %arg20: memref<8x128xbf16, #tpu.memory_space<vmem>>, %arg21: memref<1x1xf32, #tpu.memory_space<vmem>>, %arg22: memref<1x128xf32, #tpu.memory_space<vmem>>) attributes {dimension_semantics = [#tpu.dimension_semantics<parallel>], iteration_bounds = array<i64: 1>, scalar_prefetch = 0 : i64, scratch_operands = 0 : i64, tpu.core_type = #tpu.core_type<tc>, window_params = [{transform_indices = @transform_0, window_bounds = array<i64: 128, 32>}, {transform_indices = @transform_1, window_bounds = array<i64: 128, 16>}, {pipeline_mode = #tpu.pipeline_mode<synchronous>, transform_indices = @transform_2, window_bounds = array<i64: 32, 128>}, {pipeline_mode = #tpu.pipeline_mode<synchronous>, transform_indices = @transform_3, window_bounds = array<i64: 1, 128>}, {pipeline_mode = #tpu.pipeline_mode<synchronous>, transform_indices = @transform_4, window_bounds = array<i64: 128, 128>}, {pipeline_mode = #tpu.pipeline_mode<synchronous>, transform_indices = @transform_5, window_bounds = array<i64: 1, 128>}, {pipeline_mode = #tpu.pipeline_mode<synchronous>, transform_indices = @transform_6, window_bounds = array<i64: 128, 128>}, {pipeline_mode = #tpu.pipeline_mode<synchronous>, transform_indices = @transform_7, window_bounds = array<i64: 1, 128>}, {pipeline_mode = #tpu.pipeline_mode<synchronous>, transform_indices = @transform_8, window_bounds = array<i64: 16, 128>}, {pipeline_mode = #tpu.pipeline_mode<synchronous>, transform_indices = @transform_9, window_bounds = array<i64: 1, 128>}, {pipeline_mode = #tpu.pipeline_mode<synchronous>, transform_indices = @transform_10, window_bounds = array<i64: 128, 128>}, {pipeline_mode = #tpu.pipeline_mode<synchronous>, transform_indices = @transform_11, window_bounds = array<i64: 1, 128>}, {pipeline_mode = #tpu.pipeline_mode<synchronous>, transform_indices = @transform_12, window_bounds = array<i64: 128, 128>}, {pipeline_mode = #tpu.pipeline_mode<synchronous>, transform_indices = @transform_13, window_bounds = array<i64: 1, 128>}, {pipeline_mode = #tpu.pipeline_mode<synchronous>, transform_indices = @transform_14, window_bounds = array<i64: 128, 128>}, {pipeline_mode = #tpu.pipeline_mode<synchronous>, transform_indices = @transform_15, window_bounds = array<i64: 128, 128>}, {pipeline_mode = #tpu.pipeline_mode<synchronous>, transform_indices = @transform_16, window_bounds = array<i64: 1, 128>}, {pipeline_mode = #tpu.pipeline_mode<synchronous>, transform_indices = @transform_17, window_bounds = array<i64: 128, 128>}, {pipeline_mode = #tpu.pipeline_mode<synchronous>, transform_indices = @transform_18, window_bounds = array<i64: 1, 128>}, {pipeline_mode = #tpu.pipeline_mode<synchronous>, transform_indices = @transform_19, window_bounds = array<i64: 8, 128>}, {pipeline_mode = #tpu.pipeline_mode<synchronous>, transform_indices = @transform_20, window_bounds = array<i64: 1, 1>}, {transform_indices = @transform_21, window_bounds = array<i64: 1, 128>}]} {
    %c0 = arith.constant 0 : index
    %c0_0 = arith.constant 0 : index
    %0 = vector.load %arg1[%c0, %c0_0] : memref<128x32xbf16, #tpu.memory_space<vmem>>, vector<128x32xbf16>
    %c0_1 = arith.constant 0 : index
    %c0_2 = arith.constant 0 : index
    %1 = vector.load %arg3[%c0_1, %c0_2] : memref<32x128xbf16, #tpu.memory_space<vmem>>, vector<32x128xbf16>
    %cst = arith.constant dense<0.000000e+00> : vector<128x128xf32>
    %2 = tpu.matmul %0, %1, %cst {dimension_numbers = #tpu.dot_dimension_numbers<[1], [0], [0], [1], [0, 0, 1, 1], [], []>} : vector<128x32xbf16>, vector<32x128xbf16>, vector<128x128xf32> -> vector<128x128xf32>
    %c0_3 = arith.constant 0 : index
    %c0_4 = arith.constant 0 : index
    %3 = vector.load %arg4[%c0_3, %c0_4] : memref<1x128xf32, #tpu.memory_space<vmem>>, vector<1x128xf32>
    %4 = vector.broadcast %3 : vector<1x128xf32> to vector<128x128xf32>
    %5 = arith.addf %2, %4 : vector<128x128xf32>
    %cst_5 = arith.constant 0.000000e+00 : f32
    %6 = vector.broadcast %cst_5 : f32 to vector<128x128xf32>
    %7 = arith.maximumf %5, %6 : vector<128x128xf32>
    %8 = arith.truncf %7 : vector<128x128xf32> to vector<128x128xbf16>
    %c0_6 = arith.constant 0 : index
    %c0_7 = arith.constant 0 : index
    %9 = vector.load %arg5[%c0_6, %c0_7] : memref<128x128xbf16, #tpu.memory_space<vmem>>, vector<128x128xbf16>
    %cst_8 = arith.constant dense<0.000000e+00> : vector<128x128xf32>
    %10 = tpu.matmul %8, %9, %cst_8 {dimension_numbers = #tpu.dot_dimension_numbers<[1], [0], [0], [1], [0, 0, 1, 1], [], []>} : vector<128x128xbf16>, vector<128x128xbf16>, vector<128x128xf32> -> vector<128x128xf32>
    %c0_9 = arith.constant 0 : index
    %c0_10 = arith.constant 0 : index
    %11 = vector.load %arg6[%c0_9, %c0_10] : memref<1x128xf32, #tpu.memory_space<vmem>>, vector<1x128xf32>
    %12 = vector.broadcast %11 : vector<1x128xf32> to vector<128x128xf32>
    %13 = arith.addf %10, %12 : vector<128x128xf32>
    %cst_11 = arith.constant 0.000000e+00 : f32
    %14 = vector.broadcast %cst_11 : f32 to vector<128x128xf32>
    %15 = arith.maximumf %13, %14 : vector<128x128xf32>
    %16 = arith.truncf %15 : vector<128x128xf32> to vector<128x128xbf16>
    %c0_12 = arith.constant 0 : index
    %c0_13 = arith.constant 0 : index
    %17 = vector.load %arg7[%c0_12, %c0_13] : memref<128x128xbf16, #tpu.memory_space<vmem>>, vector<128x128xbf16>
    %cst_14 = arith.constant dense<0.000000e+00> : vector<128x128xf32>
    %18 = tpu.matmul %16, %17, %cst_14 {dimension_numbers = #tpu.dot_dimension_numbers<[1], [0], [0], [1], [0, 0, 1, 1], [], []>} : vector<128x128xbf16>, vector<128x128xbf16>, vector<128x128xf32> -> vector<128x128xf32>
    %c0_15 = arith.constant 0 : index
    %c0_16 = arith.constant 0 : index
    %19 = vector.load %arg8[%c0_15, %c0_16] : memref<1x128xf32, #tpu.memory_space<vmem>>, vector<1x128xf32>
    %20 = vector.broadcast %19 : vector<1x128xf32> to vector<128x128xf32>
    %21 = arith.addf %18, %20 : vector<128x128xf32>
    %cst_17 = arith.constant 0.000000e+00 : f32
    %22 = vector.broadcast %cst_17 : f32 to vector<128x128xf32>
    %23 = arith.maximumf %21, %22 : vector<128x128xf32>
    %c0_18 = arith.constant 0 : index
    %c0_19 = arith.constant 0 : index
    %24 = vector.load %arg2[%c0_18, %c0_19] : memref<128x16xbf16, #tpu.memory_space<vmem>>, vector<128x16xbf16>
    %c0_20 = arith.constant 0 : index
    %c0_21 = arith.constant 0 : index
    %25 = vector.load %arg9[%c0_20, %c0_21] : memref<16x128xbf16, #tpu.memory_space<vmem>>, vector<16x128xbf16>
    %cst_22 = arith.constant dense<0.000000e+00> : vector<128x128xf32>
    %26 = tpu.matmul %24, %25, %cst_22 {dimension_numbers = #tpu.dot_dimension_numbers<[1], [0], [0], [1], [0, 0, 1, 1], [], []>} : vector<128x16xbf16>, vector<16x128xbf16>, vector<128x128xf32> -> vector<128x128xf32>
    %c0_23 = arith.constant 0 : index
    %c0_24 = arith.constant 0 : index
    %27 = vector.load %arg10[%c0_23, %c0_24] : memref<1x128xf32, #tpu.memory_space<vmem>>, vector<1x128xf32>
    %28 = vector.broadcast %27 : vector<1x128xf32> to vector<128x128xf32>
    %29 = arith.addf %26, %28 : vector<128x128xf32>
    %cst_25 = arith.constant 0.000000e+00 : f32
    %30 = vector.broadcast %cst_25 : f32 to vector<128x128xf32>
    %31 = arith.maximumf %29, %30 : vector<128x128xf32>
    %32 = arith.truncf %31 : vector<128x128xf32> to vector<128x128xbf16>
    %c0_26 = arith.constant 0 : index
    %c0_27 = arith.constant 0 : index
    %33 = vector.load %arg11[%c0_26, %c0_27] : memref<128x128xbf16, #tpu.memory_space<vmem>>, vector<128x128xbf16>
    %cst_28 = arith.constant dense<0.000000e+00> : vector<128x128xf32>
    %34 = tpu.matmul %32, %33, %cst_28 {dimension_numbers = #tpu.dot_dimension_numbers<[1], [0], [0], [1], [0, 0, 1, 1], [], []>} : vector<128x128xbf16>, vector<128x128xbf16>, vector<128x128xf32> -> vector<128x128xf32>
    %c0_29 = arith.constant 0 : index
    %c0_30 = arith.constant 0 : index
    %35 = vector.load %arg12[%c0_29, %c0_30] : memref<1x128xf32, #tpu.memory_space<vmem>>, vector<1x128xf32>
    %36 = vector.broadcast %35 : vector<1x128xf32> to vector<128x128xf32>
    %37 = arith.addf %34, %36 : vector<128x128xf32>
    %cst_31 = arith.constant 0.000000e+00 : f32
    %38 = vector.broadcast %cst_31 : f32 to vector<128x128xf32>
    %39 = arith.maximumf %37, %38 : vector<128x128xf32>
    %40 = arith.truncf %39 : vector<128x128xf32> to vector<128x128xbf16>
    %c0_32 = arith.constant 0 : index
    %c0_33 = arith.constant 0 : index
    %41 = vector.load %arg13[%c0_32, %c0_33] : memref<128x128xbf16, #tpu.memory_space<vmem>>, vector<128x128xbf16>
    %cst_34 = arith.constant dense<0.000000e+00> : vector<128x128xf32>
    %42 = tpu.matmul %40, %41, %cst_34 {dimension_numbers = #tpu.dot_dimension_numbers<[1], [0], [0], [1], [0, 0, 1, 1], [], []>} : vector<128x128xbf16>, vector<128x128xbf16>, vector<128x128xf32> -> vector<128x128xf32>
    %c0_35 = arith.constant 0 : index
    %c0_36 = arith.constant 0 : index
    %43 = vector.load %arg14[%c0_35, %c0_36] : memref<1x128xf32, #tpu.memory_space<vmem>>, vector<1x128xf32>
    %44 = vector.broadcast %43 : vector<1x128xf32> to vector<128x128xf32>
    %45 = arith.addf %42, %44 : vector<128x128xf32>
    %cst_37 = arith.constant 0.000000e+00 : f32
    %46 = vector.broadcast %cst_37 : f32 to vector<128x128xf32>
    %47 = arith.maximumf %45, %46 : vector<128x128xf32>
    %48 = arith.truncf %23 : vector<128x128xf32> to vector<128x128xbf16>
    %c0_38 = arith.constant 0 : index
    %c0_39 = arith.constant 0 : index
    %49 = vector.load %arg15[%c0_38, %c0_39] : memref<128x128xbf16, #tpu.memory_space<vmem>>, vector<128x128xbf16>
    %cst_40 = arith.constant dense<0.000000e+00> : vector<128x128xf32>
    %50 = tpu.matmul %48, %49, %cst_40 {dimension_numbers = #tpu.dot_dimension_numbers<[1], [0], [0], [1], [0, 0, 1, 1], [], []>} : vector<128x128xbf16>, vector<128x128xbf16>, vector<128x128xf32> -> vector<128x128xf32>
    %51 = arith.truncf %47 : vector<128x128xf32> to vector<128x128xbf16>
    %c0_41 = arith.constant 0 : index
    %c0_42 = arith.constant 0 : index
    %52 = vector.load %arg16[%c0_41, %c0_42] : memref<128x128xbf16, #tpu.memory_space<vmem>>, vector<128x128xbf16>
    %cst_43 = arith.constant dense<0.000000e+00> : vector<128x128xf32>
    %53 = tpu.matmul %51, %52, %cst_43 {dimension_numbers = #tpu.dot_dimension_numbers<[1], [0], [0], [1], [0, 0, 1, 1], [], []>} : vector<128x128xbf16>, vector<128x128xbf16>, vector<128x128xf32> -> vector<128x128xf32>
    %54 = arith.addf %50, %53 : vector<128x128xf32>
    %c0_44 = arith.constant 0 : index
    %c0_45 = arith.constant 0 : index
    %55 = vector.load %arg17[%c0_44, %c0_45] : memref<1x128xf32, #tpu.memory_space<vmem>>, vector<1x128xf32>
    %56 = vector.broadcast %55 : vector<1x128xf32> to vector<128x128xf32>
    %57 = arith.addf %54, %56 : vector<128x128xf32>
    %cst_46 = arith.constant 0.000000e+00 : f32
    %58 = vector.broadcast %cst_46 : f32 to vector<128x128xf32>
    %59 = arith.maximumf %57, %58 : vector<128x128xf32>
    %60 = arith.truncf %59 : vector<128x128xf32> to vector<128x128xbf16>
    %c0_47 = arith.constant 0 : index
    %c0_48 = arith.constant 0 : index
    %61 = vector.load %arg18[%c0_47, %c0_48] : memref<128x128xbf16, #tpu.memory_space<vmem>>, vector<128x128xbf16>
    %cst_49 = arith.constant dense<0.000000e+00> : vector<128x128xf32>
    %62 = tpu.matmul %60, %61, %cst_49 {dimension_numbers = #tpu.dot_dimension_numbers<[1], [0], [0], [1], [0, 0, 1, 1], [], []>} : vector<128x128xbf16>, vector<128x128xbf16>, vector<128x128xf32> -> vector<128x128xf32>
    %c0_50 = arith.constant 0 : index
    %c0_51 = arith.constant 0 : index
    %63 = vector.load %arg19[%c0_50, %c0_51] : memref<1x128xf32, #tpu.memory_space<vmem>>, vector<1x128xf32>
    %64 = vector.broadcast %63 : vector<1x128xf32> to vector<128x128xf32>
    %65 = arith.addf %62, %64 : vector<128x128xf32>
    %cst_52 = arith.constant 0.000000e+00 : f32
    %66 = vector.broadcast %cst_52 : f32 to vector<128x128xf32>
    %67 = arith.maximumf %65, %66 : vector<128x128xf32>
    %c0_53 = arith.constant 0 : index
    %c0_54 = arith.constant 0 : index
    %68 = vector.load %arg20[%c0_53, %c0_54] : memref<8x128xbf16, #tpu.memory_space<vmem>>, vector<8x128xbf16>
    %69 = arith.truncf %67 : vector<128x128xf32> to vector<128x128xbf16>
    %cst_55 = arith.constant dense<0.000000e+00> : vector<8x128xf32>
    %70 = tpu.matmul %68, %69, %cst_55 {dimension_numbers = #tpu.dot_dimension_numbers<[1], [1], [0], [0], [0, 0, 1, 0], [], []>} : vector<8x128xbf16>, vector<128x128xbf16>, vector<8x128xf32> -> vector<8x128xf32>
    %71 = vector.extract_strided_slice %70 {offsets = [0, 0], sizes = [1, 128], strides = [1, 1]} : vector<8x128xf32> to vector<1x128xf32>
    %c0_56 = arith.constant 0 : index
    %c0_57 = arith.constant 0 : index
    %72 = vector.load %arg21[%c0_56, %c0_57] : memref<1x1xf32, #tpu.memory_space<vmem>>, vector<1x1xf32>
    %73 = vector.broadcast %72 : vector<1x1xf32> to vector<1x128xf32>
    %74 = arith.addf %71, %73 : vector<1x128xf32>
    %c0_58 = arith.constant 0 : index
    %c0_59 = arith.constant 0 : index
    %75 = vector.load %arg22[%c0_58, %c0_59] : memref<1x128xf32, #tpu.memory_space<vmem>>, vector<1x128xf32>
    tpu.vector_store %arg22[%c0_58, %c0_59], %74 {strides = array<i32>} : memref<1x128xf32, #tpu.memory_space<vmem>>, vector<1x128xf32>,
    return
  }
  func.func @transform_0(%arg0: i32) -> (i32, i32) {
    %c0_i32 = arith.constant 0 : i32
    %c0_i32_0 = arith.constant 0 : i32
    return %arg0, %c0_i32 : i32, i32
  }
  func.func @transform_1(%arg0: i32) -> (i32, i32) {
    %c0_i32 = arith.constant 0 : i32
    %c0_i32_0 = arith.constant 0 : i32
    return %arg0, %c0_i32 : i32, i32
  }
  func.func @transform_2(%arg0: i32) -> (i32, i32) {
    %c0_i32 = arith.constant 0 : i32
    %c0_i32_0 = arith.constant 0 : i32
    %c0_i32_1 = arith.constant 0 : i32
    return %c0_i32, %c0_i32_0 : i32, i32
  }
  func.func @transform_3(%arg0: i32) -> (i32, i32) {
    %c0_i32 = arith.constant 0 : i32
    %c0_i32_0 = arith.constant 0 : i32
    %c0_i32_1 = arith.constant 0 : i32
    return %c0_i32, %c0_i32_0 : i32, i32
  }
  func.func @transform_4(%arg0: i32) -> (i32, i32) {
    %c0_i32 = arith.constant 0 : i32
    %c0_i32_0 = arith.constant 0 : i32
    %c0_i32_1 = arith.constant 0 : i32
    return %c0_i32, %c0_i32_0 : i32, i32
  }
  func.func @transform_5(%arg0: i32) -> (i32, i32) {
    %c0_i32 = arith.constant 0 : i32
    %c0_i32_0 = arith.constant 0 : i32
    %c0_i32_1 = arith.constant 0 : i32
    return %c0_i32, %c0_i32_0 : i32, i32
  }
  func.func @transform_6(%arg0: i32) -> (i32, i32) {
    %c0_i32 = arith.constant 0 : i32
    %c0_i32_0 = arith.constant 0 : i32
    %c0_i32_1 = arith.constant 0 : i32
    return %c0_i32, %c0_i32_0 : i32, i32
  }
  func.func @transform_7(%arg0: i32) -> (i32, i32) {
    %c0_i32 = arith.constant 0 : i32
    %c0_i32_0 = arith.constant 0 : i32
    %c0_i32_1 = arith.constant 0 : i32
    return %c0_i32, %c0_i32_0 : i32, i32
  }
  func.func @transform_8(%arg0: i32) -> (i32, i32) {
    %c0_i32 = arith.constant 0 : i32
    %c0_i32_0 = arith.constant 0 : i32
    %c0_i32_1 = arith.constant 0 : i32
    return %c0_i32, %c0_i32_0 : i32, i32
  }
  func.func @transform_9(%arg0: i32) -> (i32, i32) {
    %c0_i32 = arith.constant 0 : i32
    %c0_i32_0 = arith.constant 0 : i32
    %c0_i32_1 = arith.constant 0 : i32
    return %c0_i32, %c0_i32_0 : i32, i32
  }
  func.func @transform_10(%arg0: i32) -> (i32, i32) {
    %c0_i32 = arith.constant 0 : i32
    %c0_i32_0 = arith.constant 0 : i32
    %c0_i32_1 = arith.constant 0 : i32
    return %c0_i32, %c0_i32_0 : i32, i32
  }
  func.func @transform_11(%arg0: i32) -> (i32, i32) {
    %c0_i32 = arith.constant 0 : i32
    %c0_i32_0 = arith.constant 0 : i32
    %c0_i32_1 = arith.constant 0 : i32
    return %c0_i32, %c0_i32_0 : i32, i32
  }
  func.func @transform_12(%arg0: i32) -> (i32, i32) {
    %c0_i32 = arith.constant 0 : i32
    %c0_i32_0 = arith.constant 0 : i32
    %c0_i32_1 = arith.constant 0 : i32
    return %c0_i32, %c0_i32_0 : i32, i32
  }
  func.func @transform_13(%arg0: i32) -> (i32, i32) {
    %c0_i32 = arith.constant 0 : i32
    %c0_i32_0 = arith.constant 0 : i32
    %c0_i32_1 = arith.constant 0 : i32
    return %c0_i32, %c0_i32_0 : i32, i32
  }
  func.func @transform_14(%arg0: i32) -> (i32, i32) {
    %c0_i32 = arith.constant 0 : i32
    %c0_i32_0 = arith.constant 0 : i32
    %c0_i32_1 = arith.constant 0 : i32
    return %c0_i32, %c0_i32_0 : i32, i32
  }
  func.func @transform_15(%arg0: i32) -> (i32, i32) {
    %c0_i32 = arith.constant 0 : i32
    %c0_i32_0 = arith.constant 0 : i32
    %c0_i32_1 = arith.constant 0 : i32
    return %c0_i32, %c0_i32_0 : i32, i32
  }
  func.func @transform_16(%arg0: i32) -> (i32, i32) {
    %c0_i32 = arith.constant 0 : i32
    %c0_i32_0 = arith.constant 0 : i32
    %c0_i32_1 = arith.constant 0 : i32
    return %c0_i32, %c0_i32_0 : i32, i32
  }
  func.func @transform_17(%arg0: i32) -> (i32, i32) {
    %c0_i32 = arith.constant 0 : i32
    %c0_i32_0 = arith.constant 0 : i32
    %c0_i32_1 = arith.constant 0 : i32
    return %c0_i32, %c0_i32_0 : i32, i32
  }
  func.func @transform_18(%arg0: i32) -> (i32, i32) {
    %c0_i32 = arith.constant 0 : i32
    %c0_i32_0 = arith.constant 0 : i32
    %c0_i32_1 = arith.constant 0 : i32
    return %c0_i32, %c0_i32_0 : i32, i32
  }
  func.func @transform_19(%arg0: i32) -> (i32, i32) {
    %c0_i32 = arith.constant 0 : i32
    %c0_i32_0 = arith.constant 0 : i32
    %c0_i32_1 = arith.constant 0 : i32
    return %c0_i32, %c0_i32_0 : i32, i32
  }
  func.func @transform_20(%arg0: i32) -> (i32, i32) {
    %c0_i32 = arith.constant 0 : i32
    %c0_i32_0 = arith.constant 0 : i32
    %c0_i32_1 = arith.constant 0 : i32
    return %c0_i32, %c0_i32_0 : i32, i32
  }
  func.func @transform_21(%arg0: i32) -> (i32, i32) {
    %c0_i32 = arith.constant 0 : i32
    %c0_i32_0 = arith.constant 0 : i32
    return %c0_i32, %arg0 : i32, i32
  }
}

</mosaic_0001>

<bundles_post_ra>
// kernel: tpu_custom_call.1
= control target key start
LH: loop header
LB: loop body
LE: loop exit
PB: predicated region body
PF: predicated region fallthrough
CT: control target
= control target key end

     0   :  { %s3446_s0 = inlined_call_operand.vmem [shape: bf16[128,32], index: 0, kind: input, shape index: {}]   ;;  %s3447_s1 = inlined_call_operand.vmem [shape: bf16[128,16], index: 1, kind: input, shape index: {}]   ;;  %s3448_s2 = inlined_call_operand.hbm [shape: bf16[32,128], index: 2, kind: input, shape index: {}]   ;;  %s3449_s3 = inlined_call_operand.vmem [shape: f32[1,128], index: 3, kind: input, shape index: {}]   ;;  %s3450_s4 = inlined_call_operand.vmem [shape: bf16[128,128], index: 4, kind: input, shape index: {}]   ;;  %s3451_s5 = inlined_call_operand.hbm [shape: f32[1,128], index: 5, kind: input, shape index: {}]   ;;  %s3452_s6 = inlined_call_operand.vmem [shape: bf16[128,128], index: 6, kind: input, shape index: {}]   ;;  %s3453_s7 = inlined_call_operand.hbm [shape: f32[1,128], index: 7, kind: input, shape index: {}]   ;;  %s3454_s8 = inlined_call_operand.hbm [shape: bf16[16,128], index: 8, kind: input, shape index: {}]   ;;  %s3455_s9 = inlined_call_operand.hbm [shape: f32[1,128], index: 9, kind: input, shape index: {}]   ;;  %s3456_s10 = inlined_call_operand.vmem [shape: bf16[128,128], index: 10, kind: input, shape index: {}]   ;;  %s3457_s11 = inlined_call_operand.hbm [shape: f32[1,128], index: 11, kind: input, shape index: {}]   ;;  %s3458_s12 = inlined_call_operand.hbm [shape: bf16[128,128], index: 12, kind: input, shape index: {}]   ;;  %s3459_s13 = inlined_call_operand.vmem [shape: f32[1,128], index: 13, kind: input, shape index: {}]   ;;  %s3460_s14 = inlined_call_operand.hbm [shape: bf16[128,128], index: 14, kind: input, shape index: {}]   ;;  %s3461_s15 = inlined_call_operand.hbm [shape: bf16[128,128], index: 15, kind: input, shape index: {}]   ;;  %s3462_s16 = inlined_call_operand.vmem [shape: f32[1,128], index: 16, kind: input, shape index: {}]   ;;  %s3463_s17 = inlined_call_operand.hbm [shape: bf16[128,128], index: 17, kind: input, shape index: {}]   ;;  %s3464_s18 = inlined_call_operand.vmem [shape: f32[1,128], index: 18, kind: input, shape index: {}]   ;;  %s3465_s19 = inlined_call_operand.vmem [shape: bf16[8,128], index: 19, kind: input, shape index: {}]   ;;  %s3466_s20 = inlined_call_operand.<no memory space> [shape: f32[1,1], index: 20, kind: input, shape index: {}]   ;;  %s3467_s21 = inlined_call_operand.hbm [shape: f32[1,128], index: 21, kind: output, shape index: {}]  }
   0x1   :  { %3473 = sst [smem:[#allocation28_spill]] %s3446_s0  ;;  %v26_v0 = vstv %s3466_s20 }
   0x2   :  { %3474 = sst [smem:[#allocation29_spill]] %s3447_s1  ;;  %27 = vst [vmem:[#allocation2] sm:$0x1] %v26_v0 }
   0x3   :  { %3475 = sst [smem:[#allocation30_spill]] %s3448_s2 }
   0x4   :  { %3476 = sst [smem:[#allocation31_spill]] %s3449_s3 }
   0x5   :  { %3477 = sst [smem:[#allocation32_spill]] %s3450_s4 }
   0x6   :  { %3478 = sst [smem:[#allocation33_spill]] %s3451_s5 }
   0x7   :  { %28 = vsyncpa [#allocation4], 0 }
   0x8   :  { %29 = vsyncpa [#allocation7], 0 }
   0x9   :  { %30 = vsyncpa [#allocation10], 0 }
   0xa   :  { %31 = vsyncpa [#allocation13], 0 }
   0xb   :  { %32 = vsyncpa [#allocation16], 0 }
   0xc   :  { %33 = vsyncpa [#allocation19], 0 }
   0xd   :  { %34 = vsyncpa [#allocation5], 0  ;;  %s2929_s26 = smov [#allocation6]   ;;  %s3479_s29 = sld [smem:[#allocation33_spill]] }
   0xe   :  { %s61_s27 = sshll.u32 %s2929_s26, 4  ;;  %s62_s27 = int_to_ptr.vmem [resolvable:$true] %s61_s27 }
  0x13   :  { %s2673_s0 = scalar_lea.hbm %s3479_s29, 16 }
  0x14   :  { %p2674_p0 = scmp.ne.s32.totalorder %s3479_s29, %s2673_s0  ;;  %p2677_p1 = scmp.lt.u32.totalorder %s2673_s0, %s3479_s29 }
  0x16   :  { %p2679_p2 = pnand %p2677_p1, %p2674_p0 }
  0x18   :  { %2682 = shalt.err (!%p2679_p2)
}
  0x19   :  { %s2683_s22 = scalar_lea.vmem %s62_s27, 16  ;;  %s2687_s23 = scalar_lea.vmem %s62_s27, 32 }
  0x1a   :  { %p2684_p3 = scmp.ne.s32.totalorder %s62_s27, %s2683_s22  ;;  %p2688_p4 = scmp.lt.s32.totalorder %s62_s27, %s62_s27 }
  0x1b   :  { %p2689_p5 = scmp.lt.s32.totalorder %s2687_s23, %s2683_s22 }
  0x1d   :  { %p2690_p6 = por %p2689_p5, %p2688_p4 }
  0x1f   :  { %p2691_p7 = pnand %p2690_p6, %p2684_p3 }
  0x21   :  { %2694 = shalt.err (!%p2691_p7)
}
  0x22   :  { %64 = dma.hbm_to_vmem [thread:$0]  %s3479_s29, 16, %s62_s27, [#allocation7]  }
  0x23   :  { %s2930_s2 = smov [#allocation9]   ;;  %s2931_s26 = smov [#allocation12]  }
  0x24   :  { %s82_s25 = sshll.u32 %s2930_s2, 4  ;;  %s107_s3 = sshll.u32 %s2931_s26, 4  ;;  %s83_s25 = int_to_ptr.vmem [resolvable:$true] %s82_s25  ;;  %s108_s3 = int_to_ptr.vmem [resolvable:$true] %s107_s3 }
  0x25   :  { %s2695_s4 = scalar_lea.hbm %s3454_s8, 128 }
  0x26   :  { %p2696_p8 = scmp.ne.s32.totalorder %s3454_s8, %s2695_s4  ;;  %p2699_p9 = scmp.lt.u32.totalorder %s2695_s4, %s3454_s8 }
  0x28   :  { %p2701_p10 = pnand %p2699_p9, %p2696_p8 }
  0x2a   :  { %2704 = shalt.err (!%p2701_p10)
}
  0x2b   :  { %s2705_s27 = scalar_lea.vmem %s83_s25, 128  ;;  %p2710_p12 = scmp.lt.s32.totalorder %s83_s25, %s83_s25 }
  0x2c   :  { %p2706_p11 = scmp.ne.s32.totalorder %s83_s25, %s2705_s27  ;;  %p2711_p13 = scmp.lt.s32.totalorder %s2705_s27, %s2705_s27 }
  0x2e   :  { %p2712_p0 = por %p2711_p13, %p2710_p12 }
  0x30   :  { %p2713_p1 = pnand %p2712_p0, %p2706_p11 }
  0x32   :  { %2716 = shalt.err (!%p2713_p1)
}
  0x33   :  { %s2932_s29 = smov 64   ;;  %s2933_s23 = smov 4  }
  0x34   :  { %88 = dma.hbm_to_vmem [thread:$0]  %s3454_s8, 128, %s83_s25, [#allocation10], %s2932_s29, %s2932_s29, %s2933_s23  }
  0x35   :  { %s2717_s28 = scalar_lea.hbm %s3457_s11, 16 }
  0x36   :  { %p2718_p2 = scmp.ne.s32.totalorder %s3457_s11, %s2717_s28  ;;  %p2721_p3 = scmp.lt.u32.totalorder %s2717_s28, %s3457_s11 }
  0x38   :  { %p2723_p4 = pnand %p2721_p3, %p2718_p2 }
  0x3a   :  { %2726 = shalt.err (!%p2723_p4)
}
  0x3b   :  { %s2727_s5 = scalar_lea.vmem %s108_s3, 16  ;;  %s2731_s22 = scalar_lea.vmem %s108_s3, 32 }
  0x3c   :  { %p2728_p5 = scmp.ne.s32.totalorder %s108_s3, %s2727_s5  ;;  %p2732_p6 = scmp.lt.s32.totalorder %s108_s3, %s108_s3 }
  0x3d   :  { %p2733_p7 = scmp.lt.s32.totalorder %s2731_s22, %s2727_s5 }
  0x3f   :  { %p2734_p8 = por %p2733_p7, %p2732_p6 }
  0x41   :  { %p2735_p9 = pnand %p2734_p8, %p2728_p5 }
  0x43   :  { %2738 = shalt.err (!%p2735_p9)
}
  0x44   :  { %110 = dma.hbm_to_vmem [thread:$0]  %s3457_s11, 16, %s108_s3, [#allocation13]  }
  0x45   :  { %s2934_s27 = smov [#allocation15]   ;;  %s2935_s24 = smov [#allocation3]  }
  0x46   :  { %s130_s1 = sshll.u32 %s2934_s27, 4  ;;  %s44_s2 = sshll.u32 %s2935_s24, 4  ;;  %s131_s1 = int_to_ptr.vmem [resolvable:$true] %s130_s1  ;;  %s45_s2 = int_to_ptr.vmem [resolvable:$true] %s44_s2 }
  0x47   :  { %s2739_s0 = scalar_lea.hbm %s3460_s14, 1024 }
  0x48   :  { %p2740_p10 = scmp.ne.s32.totalorder %s3460_s14, %s2739_s0  ;;  %p2743_p11 = scmp.lt.u32.totalorder %s2739_s0, %s3460_s14 }
  0x4a   :  { %p2745_p12 = pnand %p2743_p11, %p2740_p10 }
  0x4c   :  { %2748 = shalt.err (!%p2745_p12)
}
  0x4d   :  { %s2749_s11 = scalar_lea.vmem %s131_s1, 1024  ;;  %p2754_p0 = scmp.lt.s32.totalorder %s131_s1, %s131_s1 }
  0x4e   :  { %p2750_p13 = scmp.ne.s32.totalorder %s131_s1, %s2749_s11  ;;  %p2755_p1 = scmp.lt.s32.totalorder %s2749_s11, %s2749_s11 }
  0x50   :  { %p2756_p2 = por %p2755_p1, %p2754_p0 }
  0x52   :  { %p2757_p3 = pnand %p2756_p2, %p2750_p13 }
  0x54   :  { %2760 = shalt.err (!%p2757_p3)
}
  0x55   :  { %136 = dma.hbm_to_vmem [thread:$0]  %s3460_s14, 1024, %s131_s1, [#allocation16], %s2932_s29, %s2932_s29, %s2933_s23  }
  0x56   :  { %s3480_s27 = sld [smem:[#allocation30_spill]] }
  0x5c   :  { %s2761_s24 = scalar_lea.hbm %s3480_s27, 256 }
  0x5d   :  { %p2762_p4 = scmp.ne.s32.totalorder %s3480_s27, %s2761_s24  ;;  %p2765_p5 = scmp.lt.u32.totalorder %s2761_s24, %s3480_s27 }
  0x5f   :  { %p2767_p6 = pnand %p2765_p5, %p2762_p4 }
  0x61   :  { %2770 = shalt.err (!%p2767_p6)
}
  0x62   :  { %s2771_s30 = scalar_lea.vmem %s45_s2, 256  ;;  %p2776_p8 = scmp.lt.s32.totalorder %s45_s2, %s45_s2 }
  0x63   :  { %p2772_p7 = scmp.ne.s32.totalorder %s45_s2, %s2771_s30  ;;  %p2777_p9 = scmp.lt.s32.totalorder %s2771_s30, %s2771_s30 }
  0x65   :  { %p2778_p10 = por %p2777_p9, %p2776_p8 }
  0x67   :  { %p2779_p11 = pnand %p2778_p10, %p2772_p7 }
  0x69   :  { %2782 = shalt.err (!%p2779_p11)
}
  0x6a   :  { %50 = dma.hbm_to_vmem [thread:$0]  %s3480_s27, 256, %s45_s2, [#allocation4], %s2932_s29, %s2932_s29, %s2933_s23  }
  0x6b   :  { %s2936_s20 = smov [#allocation8]   ;;  %s2937_s11 = smov [#allocation11]  }
  0x6c   :  { %s73_s5 = sshll.u32 %s2936_s20, 4  ;;  %s95_s3 = sshll.u32 %s2937_s11, 4  ;;  %s74_s5 = int_to_ptr.vmem [resolvable:$true] %s73_s5  ;;  %s96_s3 = int_to_ptr.vmem [resolvable:$true] %s95_s3 }
  0x6d   :  { %s2783_s25 = scalar_lea.hbm %s3453_s7, 16 }
  0x6e   :  { %p2784_p12 = scmp.ne.s32.totalorder %s3453_s7, %s2783_s25  ;;  %p2787_p13 = scmp.lt.u32.totalorder %s2783_s25, %s3453_s7 }
  0x70   :  { %p2789_p0 = pnand %p2787_p13, %p2784_p12 }
  0x72   :  { %2792 = shalt.err (!%p2789_p0)
}
  0x73   :  { %s2793_s2 = scalar_lea.vmem %s74_s5, 16  ;;  %s2797_s27 = scalar_lea.vmem %s74_s5, 32 }
  0x74   :  { %p2794_p1 = scmp.ne.s32.totalorder %s74_s5, %s2793_s2  ;;  %p2798_p2 = scmp.lt.s32.totalorder %s74_s5, %s74_s5 }
  0x75   :  { %p2799_p3 = scmp.lt.s32.totalorder %s2797_s27, %s2793_s2 }
  0x77   :  { %p2800_p4 = por %p2799_p3, %p2798_p2 }
  0x79   :  { %p2801_p5 = pnand %p2800_p4, %p2794_p1 }
  0x7b   :  { %2804 = shalt.err (!%p2801_p5)
}
  0x7c   :  { %76 = dma.hbm_to_vmem [thread:$0]  %s3453_s7, 16, %s74_s5, [#allocation7]  }
  0x7d   :  { %s2805_s20 = scalar_lea.hbm %s3455_s9, 16 }
  0x7e   :  { %p2806_p6 = scmp.ne.s32.totalorder %s3455_s9, %s2805_s20  ;;  %p2809_p7 = scmp.lt.u32.totalorder %s2805_s20, %s3455_s9 }
  0x80   :  { %p2811_p8 = pnand %p2809_p7, %p2806_p6 }
  0x82   :  { %2814 = shalt.err (!%p2811_p8)
}
  0x83   :  { %s2815_s24 = scalar_lea.vmem %s96_s3, 16  ;;  %s2819_s26 = scalar_lea.vmem %s96_s3, 32 }
  0x84   :  { %p2816_p9 = scmp.ne.s32.totalorder %s96_s3, %s2815_s24  ;;  %p2820_p10 = scmp.lt.s32.totalorder %s96_s3, %s96_s3 }
  0x85   :  { %p2821_p11 = scmp.lt.s32.totalorder %s2819_s26, %s2815_s24 }
  0x87   :  { %p2822_p12 = por %p2821_p11, %p2820_p10 }
  0x89   :  { %p2823_p13 = pnand %p2822_p12, %p2816_p9 }
  0x8b   :  { %2826 = shalt.err (!%p2823_p13)
}
  0x8c   :  { %98 = dma.hbm_to_vmem [thread:$0]  %s3455_s9, 16, %s96_s3, [#allocation10]  }
  0x8d   :  { %s2938_s28 = smov [#allocation14]   ;;  %s2939_s2 = smov [#allocation17]  }
  0x8e   :  { %s116_s0 = sshll.u32 %s2938_s28, 4  ;;  %s142_s27 = sshll.u32 %s2939_s2, 4  ;;  %s117_s0 = int_to_ptr.vmem [resolvable:$true] %s116_s0  ;;  %s143_s27 = int_to_ptr.vmem [resolvable:$true] %s142_s27 }
  0x8f   :  { %s2827_s14 = scalar_lea.hbm %s3458_s12, 1024 }
  0x90   :  { %p2828_p0 = scmp.ne.s32.totalorder %s3458_s12, %s2827_s14  ;;  %p2831_p1 = scmp.lt.u32.totalorder %s2827_s14, %s3458_s12 }
  0x92   :  { %p2833_p2 = pnand %p2831_p1, %p2828_p0 }
  0x94   :  { %2836 = shalt.err (!%p2833_p2)
}
  0x95   :  { %s2837_s9 = scalar_lea.vmem %s117_s0, 1024  ;;  %p2842_p4 = scmp.lt.s32.totalorder %s117_s0, %s117_s0 }
  0x96   :  { %p2838_p3 = scmp.ne.s32.totalorder %s117_s0, %s2837_s9  ;;  %p2843_p5 = scmp.lt.s32.totalorder %s2837_s9, %s2837_s9 }
  0x98   :  { %p2844_p6 = por %p2843_p5, %p2842_p4 }
  0x9a   :  { %p2845_p7 = pnand %p2844_p6, %p2838_p3 }
  0x9c   :  { %2848 = shalt.err (!%p2845_p7)
}
  0x9d   :  { %122 = dma.hbm_to_vmem [thread:$0]  %s3458_s12, 1024, %s117_s0, [#allocation13], %s2932_s29, %s2932_s29, %s2933_s23  }
  0x9e   :  { %s2849_s26 = scalar_lea.hbm %s3461_s15, 1024 }
  0x9f   :  { %p2850_p8 = scmp.ne.s32.totalorder %s3461_s15, %s2849_s26  ;;  %p2853_p9 = scmp.lt.u32.totalorder %s2849_s26, %s3461_s15 }
  0xa1   :  { %p2855_p10 = pnand %p2853_p9, %p2850_p8 }
  0xa3   :  { %2858 = shalt.err (!%p2855_p10)
}
  0xa4   :  { %s2859_s4 = scalar_lea.vmem %s143_s27, 1024  ;;  %p2864_p12 = scmp.lt.s32.totalorder %s143_s27, %s143_s27 }
  0xa5   :  { %p2860_p11 = scmp.ne.s32.totalorder %s143_s27, %s2859_s4  ;;  %p2865_p13 = scmp.lt.s32.totalorder %s2859_s4, %s2859_s4 }
  0xa7   :  { %p2866_p0 = por %p2865_p13, %p2864_p12 }
  0xa9   :  { %p2867_p1 = pnand %p2866_p0, %p2860_p11 }
  0xab   :  { %2870 = shalt.err (!%p2867_p1)
}
  0xac   :  { %148 = dma.hbm_to_vmem [thread:$0]  %s3461_s15, 1024, %s143_s27, [#allocation16], %s2932_s29, %s2932_s29, %s2933_s23  }
  0xad   :  { %s2940_s30 = smov [#allocation18]   ;;  %s2871_s11 = scalar_lea.hbm %s3463_s17, 1024 }
  0xae   :  { %s156_s14 = sshll.u32 %s2940_s30, 4  ;;  %p2872_p2 = scmp.ne.s32.totalorder %s3463_s17, %s2871_s11  ;;  %s157_s14 = int_to_ptr.vmem [resolvable:$true] %s156_s14 }
  0xaf   :  { %p2875_p3 = scmp.lt.u32.totalorder %s2871_s11, %s3463_s17 }
  0xb1   :  { %p2877_p4 = pnand %p2875_p3, %p2872_p2 }
  0xb3   :  { %2880 = shalt.err (!%p2877_p4)
}
  0xb4   :  { %s2881_s25 = scalar_lea.vmem %s157_s14, 1024  ;;  %p2886_p6 = scmp.lt.s32.totalorder %s157_s14, %s157_s14 }
  0xb5   :  { %p2882_p5 = scmp.ne.s32.totalorder %s157_s14, %s2881_s25  ;;  %p2887_p7 = scmp.lt.s32.totalorder %s2881_s25, %s2881_s25 }
  0xb7   :  { %p2888_p8 = por %p2887_p7, %p2886_p6 }
  0xb9   :  { %p2889_p9 = pnand %p2888_p8, %p2882_p5 }
  0xbb   :  { %2892 = shalt.err (!%p2889_p9)
}
  0xbc   :  { %162 = dma.hbm_to_vmem [thread:$0]  %s3463_s17, 1024, %s157_s14, [#allocation19], %s2932_s29, %s2932_s29, %s2933_s23  }
  0xbd   :  { %2915 = dma.done.wait [#allocation4], 256  }
  0xbe   :  { %2916 = vsyncadd [#allocation4], 4294967040 }
  0xbf   :  { %2917 = dma.done.wait [#allocation7], 32  }
  0xc0   :  { %2918 = vsyncadd [#allocation7], 4294967264 }
  0xc1   :  { %2919 = dma.done.wait [#allocation10], 144  }
  0xc2   :  { %2920 = vsyncadd [#allocation10], 4294967152 }
  0xc3   :  { %2921 = dma.done.wait [#allocation13], 1040  }
  0xc4   :  { %2922 = vsyncadd [#allocation13], 4294966256 }
  0xc5   :  { %2923 = dma.done.wait [#allocation16], 2048  }
  0xc6   :  { %2924 = vsyncadd [#allocation16], 4294965248 }
  0xc7   :  { %2925 = dma.done.wait [#allocation19], 1024  }
  0xc8   :  { %2926 = vsyncadd [#allocation19], 4294966272  ;;  %v2598_v1 = vld [vmem:[#allocation3] sm:$0xff]   ;;  %v2599_v2 = vld [vmem:[#allocation3 + $0x8] sm:$0xff]   ;;  %vm279_vm0 = vcmask 261120   ;;  %s3481_s7 = sld [smem:[#allocation28_spill]] }
  0xc9   :  { %2283 = vmatprep.subr.bf16.mxu0 %v2598_v1  ;;  %s3482_s4 = sld [smem:[#allocation32_spill]]  ;;  %v2616_v19 = vld [vmem:[#allocation9] sm:$0xff]   ;;  %v2625_v20 = vld [vmem:[%s3452_s6] sm:$0xff]   ;;  %v2626_v21 = vld [vmem:[%s3452_s6 + $0x8] sm:$0xff]   ;;  %s3483_s24 = sld [smem:[#allocation31_spill]]  ;;  %vm872_vm1 = vcmask 130048  }
  0xca   :  { %2284 = vmatpush3.bf16.msra.mxu0 %v2598_v1  ;;  %v2627_v22 = vld [vmem:[%s3452_s6 + $0x10] sm:$0xff]   ;;  %v2628_v23 = vld [vmem:[%s3452_s6 + $0x18] sm:$0xff]   ;;  %v2629_v24 = vld [vmem:[%s3452_s6 + $0x20] sm:$0xff]   ;;  %s3484_s29 = sld [smem:[#allocation29_spill]]  ;;  %vm2942_vm2 = vmmov 0   ;;  %s2944_s22 = smov [#allocation20]  }
  0xcb   :  { %2285 = vmatprep.subr.bf16.mxu0 %v2599_v2  ;;  %v2630_v25 = vld [vmem:[%s3452_s6 + $0x28] sm:$0xff]   ;;  %s2030_s9 = sshll.u32 %s2944_s22, 4  ;;  %s2031_s9 = int_to_ptr.vmem [resolvable:$true] %s2030_s9 }
  0xcc   :  { %s2893_s3 = scalar_lea.vmem %s2031_s9, 16  ;;  %s2897_s8 = scalar_lea.vmem %s2031_s9, 32 }
  0xcd   :  { %p2894_p10 = scmp.ne.s32.totalorder %s2031_s9, %s2893_s3  ;;  %p2898_p11 = scmp.lt.s32.totalorder %s2031_s9, %s2031_s9 }
  0xce   :  { %v2600_v3 = vld [vmem:[%s3481_s7] sm:$0xff]   ;;  %v2601_v4 = vld [vmem:[%s3481_s7 + $0x8] sm:$0xff]   ;;  %2286 = vmatpush3.bf16.msra.mxu0 %v2599_v2  ;;  %v2602_v5 = vld [vmem:[%s3481_s7 + $0x10] sm:$0xff]   ;;  %p2899_p12 = scmp.lt.s32.totalorder %s2897_s8, %s2893_s3 }
  0xcf   :  { %2287 = vmatprep.mubr.msk.bf16.mxu0 %vm279_vm0, %v2600_v3  ;;  %v2608_v6 = vld [vmem:[%s3482_s4] sm:$0xff]   ;;  %v2609_v7 = vld [vmem:[%s3482_s4 + $0x8] sm:$0xff]   ;;  %v2603_v8 = vld [vmem:[%s3481_s7 + $0x18] sm:$0xff]   ;;  %2335 = vmatprep.subr.bf16.mxu0 %v2625_v20 }
  0xd0   :  { %2303 = vmatprep.subr.bf16.mxu1 %v2608_v6  ;;  %v2610_v9 = vld [vmem:[%s3482_s4 + $0x10] sm:$0xff]   ;;  %v2604_v10 = vld [vmem:[%s3481_s7 + $0x20] sm:$0xff]   ;;  %v2611_v11 = vld [vmem:[%s3482_s4 + $0x18] sm:$0xff]   ;;  %p2900_p13 = por %p2899_p12, %p2898_p11 }
  0xd1   :  { %2288 = vmatmul.mubr.msk.bf16.vlgmr.msra.gmra.mrb[0].mxu0 %vm279_vm0, %v2601_v4  ;;  %2304 = vmatpush3.bf16.msra.mxu1 %v2608_v6  ;;  %v2605_v12 = vld [vmem:[%s3481_s7 + $0x28] sm:$0xff]   ;;  %v2612_v13 = vld [vmem:[%s3482_s4 + $0x20] sm:$0xff]   ;;  %v2606_v14 = vld [vmem:[%s3481_s7 + $0x30] sm:$0xff]  }
  0xd2   :  { %2291 = vmatprep.mubr.msk.bf16.mxu0 %vm279_vm0, %v2602_v5  ;;  %2305 = vmatprep.subr.bf16.mxu1 %v2609_v7  ;;  %v2613_v15 = vld [vmem:[%s3482_s4 + $0x28] sm:$0xff]   ;;  %v2607_v16 = vld [vmem:[%s3481_s7 + $0x38] sm:$0xff]   ;;  %v2614_v17 = vld [vmem:[%s3482_s4 + $0x30] sm:$0xff]   ;;  %p2901_p0 = pnand %p2900_p13, %p2894_p10 }
  0xd3   :  { %v2615_v18 = vld [vmem:[%s3482_s4 + $0x38] sm:$0xff]   ;;  %2336 = vmatpush3.bf16.msra.mxu0 %v2625_v20  ;;  %v2044_v26 = vld [vmem:[%s3483_s24] ss:$0 sm:$0xff]  ;;  %v2618_v20 = vld [vmem:[%s3484_s29 + $0x8] sm:$0xff]  }
  0xd4   :  { %2337 = vmatprep.subr.bf16.mxu0 %v2626_v21 }
  0xd5   :  { %2306 = vmatpush3.bf16.msra.mxu1 %v2609_v7 }
  0xd6   :  { %2307 = vmatprep.subr.bf16.mxu1 %v2610_v9 }
  0xd7   :  { %2338 = vmatpush3.bf16.msra.mxu0 %v2626_v21  ;;  %v2619_v21 = vld [vmem:[%s3484_s29 + $0x10] sm:$0xff]  }
  0xd8   :  { %2339 = vmatprep.subr.bf16.mxu0 %v2627_v22 }
  0xd9   :  { %2292 = vmatmul.mubr.msk.bf16.gmra.mrb[4].mxu0 %vm279_vm0, %v2603_v8  ;;  %2308 = vmatpush3.bf16.msra.mxu1 %v2610_v9 }
  0xda   :  { %2295 = vmatprep.mubr.msk.bf16.mxu0 %vm279_vm0, %v2604_v10  ;;  %2309 = vmatprep.subr.bf16.mxu1 %v2611_v11 }
  0xdb   :  { %2340 = vmatpush3.bf16.msra.mxu0 %v2627_v22  ;;  %v2620_v22 = vld [vmem:[%s3484_s29 + $0x18] sm:$0xff]  }
  0xdc   :  { %2341 = vmatprep.subr.bf16.mxu0 %v2628_v23 }
  0xdd   :  { %2310 = vmatpush3.bf16.msra.mxu1 %v2611_v11 }
  0xde   :  { %2311 = vmatprep.subr.bf16.mxu1 %v2612_v13 }
  0xdf   :  { %2342 = vmatpush3.bf16.msra.mxu0 %v2628_v23  ;;  %v2621_v23 = vld [vmem:[%s3484_s29 + $0x20] sm:$0xff]  }
  0xe0   :  { %2343 = vmatprep.subr.bf16.mxu0 %v2629_v24 }
  0xe1   :  { %2296 = vmatmul.mubr.msk.bf16.gmra.mrb[8].mxu0 %vm279_vm0, %v2605_v12  ;;  %2312 = vmatpush3.bf16.msra.mxu1 %v2612_v13 }
  0xe2   :  { %2299 = vmatprep.mubr.msk.bf16.mxu0 %vm279_vm0, %v2606_v14  ;;  %2313 = vmatprep.subr.bf16.mxu1 %v2613_v15 }
  0xe3   :  { %2344 = vmatpush3.bf16.msra.mxu0 %v2629_v24  ;;  %v2622_v24 = vld [vmem:[%s3484_s29 + $0x28] sm:$0xff]  }
  0xe4   :  { %2345 = vmatprep.subr.bf16.mxu0 %v2630_v25 }
  0xe5   :  { %2314 = vmatpush3.bf16.msra.mxu1 %v2613_v15 }
  0xe6   :  { %2315 = vmatprep.subr.bf16.mxu1 %v2614_v17 }
  0xe7   :  { %2346 = vmatpush3.bf16.msra.mxu0 %v2630_v25  ;;  %v2623_v25 = vld [vmem:[%s3484_s29 + $0x30] sm:$0xff]  }
  0xe9   :  { %2300 = vmatmul.mubr.msk.bf16.gmra.mrb[12].mxu0 %vm279_vm0, %v2607_v16  ;;  %2316 = vmatpush3.bf16.msra.mxu1 %v2614_v17 }
  0xea   :  { %2317 = vmatprep.subr.bf16.mxu1 %v2615_v18 }
  0xed   :  { %2318 = vmatpush3.bf16.msra.mxu1 %v2615_v18 }
  0xee   :  { %2367 = vmatprep.subr.bf16.mxu1 %v2616_v19 }
 0x1a4   :  { %v2289_v27 = vpop.f32.mrb[0].mxu0 }
 0x1a5   :  { %v347_v28 = vadd.f32 %v2289_v27, %v2044_v26  ;;  %v338_v29 = vpop.f32.mrb[1].mxu0  ;;  %v2631_v27 = vld [vmem:[%s3452_s6 + $0x30] sm:$0xff]  }
 0x1a6   :  { %v339_v30 = vadd.f32 %v2044_v26, %v338_v29  ;;  %v2290_v31 = vpop.f32.mrb[2].mxu0  ;;  %2347 = vmatprep.subr.bf16.mxu0 %v2631_v27  ;;  %v2633_v29 = vld [vmem:[%s3456_s10] sm:$0xff]  }
 0x1a7   :  { %v350_v32 = vadd.f32 %v2290_v31, %v2044_v26  ;;  %v341_v33 = vpop.f32.mrb[3].mxu0  ;;  %v403_v35 = vmax.f32 %v347_v28, 0.0  ;;  %2348 = vmatpush3.bf16.msra.mxu0 %v2631_v27  ;;  %v2632_v28 = vld [vmem:[%s3452_s6 + $0x38] sm:$0xff]  }
 0x1a8   :  { %v342_v34 = vadd.f32 %v2044_v26, %v341_v33  ;;  %v401_v37 = vmax.f32 %v339_v30, 0.0  ;;  %2349 = vmatprep.subr.bf16.mxu0 %v2632_v28  ;;  %v3314_v30 = vld [vmem:[#allocation6] ss:$0 sm:$0xff]  ;;  %v3350_v27 = vld [vmem:[#allocation11] ss:$0 sm:$0xff] }
 0x1a9   :  { %v404_v36 = vmax.f32 %v350_v32, 0.0 }
 0x1aa   :  { %v402_v38 = vmax.f32 %v342_v34, 0.0 }
 0x1ab   :  { %v418_v39 = vpack.c.bf16 %v404_v36, %v403_v35  ;;  %2350 = vmatpush3.bf16.msra.mxu0 %v2632_v28 }
 0x1ac   :  { %v2293_v40 = vpop.f32.mrb[4].mxu0  ;;  %v417_v41 = vpack.c.bf16 %v402_v38, %v401_v37  ;;  %2385 = vmatprep.subr.bf16.mxu0 %v2633_v29 }
 0x1ad   :  { %v363_v42 = vadd.f32 %v2293_v40, %v2044_v26  ;;  %v354_v43 = vpop.f32.mrb[5].mxu0 }
 0x1ae   :  { %v355_v44 = vadd.f32 %v2044_v26, %v354_v43  ;;  %v2294_v45 = vpop.f32.mrb[6].mxu0  ;;  %2319 = vmatprep.mubr.bf16.mxu1 %v417_v41 }
 0x1af   :  { %v366_v46 = vadd.f32 %v2294_v45, %v2044_v26  ;;  %v357_v47 = vpop.f32.mrb[7].mxu0  ;;  %2320 = vmatmul.mubr.bf16.vlgmr.msra.gmra.mrb[0].mxu1 %v418_v39  ;;  %v407_v49 = vmax.f32 %v363_v42, 0.0 }
 0x1b0   :  { %v358_v48 = vadd.f32 %v2044_v26, %v357_v47  ;;  %2368 = vmatpush3.bf16.msra.mxu1 %v2616_v19  ;;  %v405_v51 = vmax.f32 %v355_v44, 0.0  ;;  %v2617_v19 = vld [vmem:[%s3484_s29] sm:$0xff]  }
 0x1b1   :  { %v408_v50 = vmax.f32 %v366_v46, 0.0 }
 0x1b2   :  { %v406_v52 = vmax.f32 %v358_v48, 0.0  ;;  %v2634_v48 = vld [vmem:[%s3456_s10 + $0x8] sm:$0xff]  }
 0x1b3   :  { %v420_v53 = vpack.c.bf16 %v408_v50, %v407_v49 }
 0x1b4   :  { %v419_v54 = vpack.c.bf16 %v406_v52, %v405_v51  ;;  %v2297_v55 = vpop.f32.mrb[8].mxu0 }
 0x1b5   :  { %v379_v56 = vadd.f32 %v2297_v55, %v2044_v26  ;;  %v370_v57 = vpop.f32.mrb[9].mxu0 }
 0x1b6   :  { %v371_v58 = vadd.f32 %v2044_v26, %v370_v57  ;;  %v2298_v59 = vpop.f32.mrb[10].mxu0  ;;  %2323 = vmatprep.mubr.bf16.mxu1 %v419_v54 }
 0x1b7   :  { %v382_v60 = vadd.f32 %v2298_v59, %v2044_v26  ;;  %v373_v61 = vpop.f32.mrb[11].mxu0  ;;  %2324 = vmatmul.mubr.bf16.gmra.mrb[4].mxu1 %v420_v53  ;;  %v411_v63 = vmax.f32 %v379_v56, 0.0  ;;  %v2635_v56 = vld [vmem:[%s3456_s10 + $0x10] sm:$0xff]  }
 0x1b8   :  { %v374_v62 = vadd.f32 %v2044_v26, %v373_v61  ;;  %v409_v1 = vmax.f32 %v371_v58, 0.0 }
 0x1b9   :  { %v412_v0 = vmax.f32 %v382_v60, 0.0 }
 0x1ba   :  { %v410_v2 = vmax.f32 %v374_v62, 0.0 }
 0x1bb   :  { %v422_v3 = vpack.c.bf16 %v412_v0, %v411_v63  ;;  %v2636_v0 = vld [vmem:[%s3456_s10 + $0x18] sm:$0xff]  }
 0x1bc   :  { %v421_v4 = vpack.c.bf16 %v410_v2, %v409_v1  ;;  %v2301_v5 = vpop.f32.mrb[12].mxu0 }
 0x1bd   :  { %v395_v6 = vadd.f32 %v2301_v5, %v2044_v26  ;;  %v386_v7 = vpop.f32.mrb[13].mxu0 }
 0x1be   :  { %v387_v8 = vadd.f32 %v2044_v26, %v386_v7  ;;  %v2302_v9 = vpop.f32.mrb[14].mxu0  ;;  %2327 = vmatprep.mubr.bf16.mxu1 %v421_v4 }
 0x1bf   :  { %v398_v10 = vadd.f32 %v2302_v9, %v2044_v26  ;;  %v389_v11 = vpop.f32.mrb[15].mxu0  ;;  %2328 = vmatmul.mubr.bf16.gmra.mrb[8].mxu1 %v422_v3  ;;  %v415_v13 = vmax.f32 %v395_v6, 0.0 }
 0x1c0   :  { %v390_v12 = vadd.f32 %v2044_v26, %v389_v11  ;;  %v413_v15 = vmax.f32 %v387_v8, 0.0  ;;  %v2624_v26 = vld [vmem:[%s3484_s29 + $0x38] sm:$0xff]   ;;  %v2637_v8 = vld [vmem:[%s3456_s10 + $0x20] sm:$0xff]  }
 0x1c1   :  { %v416_v14 = vmax.f32 %v398_v10, 0.0 }
 0x1c2   :  { %v414_v16 = vmax.f32 %v390_v12, 0.0 }
 0x1c3   :  { %v424_v17 = vpack.c.bf16 %v416_v14, %v415_v13 }
 0x1c4   :  { %v423_v18 = vpack.c.bf16 %v414_v16, %v413_v15  ;;  %v2638_v16 = vld [vmem:[%s3456_s10 + $0x28] sm:$0xff]  }
 0x1c6   :  { %2331 = vmatprep.mubr.bf16.mxu1 %v423_v18 }
 0x1c7   :  { %2332 = vmatmul.mubr.bf16.gmra.mrb[12].mxu1 %v424_v17 }
 0x1c8   :  { %2369 = vmatprep.mubr.msk.bf16.mxu1 %vm872_vm1, %v2617_v19 }
 0x1cf   :  { %2370 = vmatmul.mubr.msk.bf16.vlgmr.msra.gmra.mrb[16].mxu1 %vm872_vm1, %v2618_v20 }
 0x1d0   :  { %2373 = vmatprep.mubr.msk.bf16.mxu1 %vm872_vm1, %v2619_v21 }
 0x1d7   :  { %2374 = vmatmul.mubr.msk.bf16.gmra.mrb[20].mxu1 %vm872_vm1, %v2620_v22 }
 0x1d8   :  { %2377 = vmatprep.mubr.msk.bf16.mxu1 %vm872_vm1, %v2621_v23 }
 0x1df   :  { %2378 = vmatmul.mubr.msk.bf16.gmra.mrb[24].mxu1 %vm872_vm1, %v2622_v24  ;;  %v2639_v24 = vld [vmem:[%s3456_s10 + $0x30] sm:$0xff]  }
 0x1e0   :  { %2381 = vmatprep.mubr.msk.bf16.mxu1 %vm872_vm1, %v2623_v25 }
 0x1e7   :  { %2382 = vmatmul.mubr.msk.bf16.gmra.mrb[28].mxu1 %vm872_vm1, %v2624_v26 }
 0x282   :  { %v2321_v31 = vpop.f32.mrb[0].mxu1 }
 0x283   :  { %v539_v32 = vadd.f32 %v2321_v31, %v3314_v30  ;;  %v530_v33 = vpop.f32.mrb[1].mxu1 }
 0x284   :  { %v531_v34 = vadd.f32 %v3314_v30, %v530_v33  ;;  %v2322_v35 = vpop.f32.mrb[2].mxu1 }
 0x285   :  { %v542_v36 = vadd.f32 %v2322_v35, %v3314_v30  ;;  %v533_v37 = vpop.f32.mrb[3].mxu1  ;;  %v595_v39 = vmax.f32 %v539_v32, 0.0 }
 0x286   :  { %v534_v38 = vadd.f32 %v3314_v30, %v533_v37  ;;  %v593_v41 = vmax.f32 %v531_v34, 0.0 }
 0x287   :  { %v596_v40 = vmax.f32 %v542_v36, 0.0 }
 0x288   :  { %v594_v42 = vmax.f32 %v534_v38, 0.0 }
 0x289   :  { %v610_v43 = vpack.c.bf16 %v596_v40, %v595_v39 }
 0x28a   :  { %v609_v44 = vpack.c.bf16 %v594_v42, %v593_v41  ;;  %v2325_v45 = vpop.f32.mrb[4].mxu1 }
 0x28b   :  { %v555_v46 = vadd.f32 %v2325_v45, %v3314_v30  ;;  %v546_v47 = vpop.f32.mrb[5].mxu1 }
 0x28c   :  { %v547_v49 = vadd.f32 %v3314_v30, %v546_v47  ;;  %v2326_v50 = vpop.f32.mrb[6].mxu1  ;;  %2351 = vmatprep.mubr.bf16.mxu0 %v609_v44 }
 0x28d   :  { %v558_v51 = vadd.f32 %v2326_v50, %v3314_v30  ;;  %v549_v52 = vpop.f32.mrb[7].mxu1  ;;  %2352 = vmatmul.mubr.bf16.vlgmr.msra.gmra.mrb[16].mxu0 %v610_v43  ;;  %v599_v54 = vmax.f32 %v555_v46, 0.0 }
 0x28e   :  { %v550_v53 = vadd.f32 %v3314_v30, %v549_v52  ;;  %2386 = vmatpush3.bf16.msra.mxu0 %v2633_v29  ;;  %v597_v57 = vmax.f32 %v547_v49, 0.0 }
 0x28f   :  { %v600_v55 = vmax.f32 %v558_v51, 0.0  ;;  %2387 = vmatprep.subr.bf16.mxu0 %v2634_v48 }
 0x290   :  { %v598_v58 = vmax.f32 %v550_v53, 0.0 }
 0x291   :  { %v612_v59 = vpack.c.bf16 %v600_v55, %v599_v54 }
 0x292   :  { %v611_v60 = vpack.c.bf16 %v598_v58, %v597_v57  ;;  %2388 = vmatpush3.bf16.msra.mxu0 %v2634_v48  ;;  %v2329_v61 = vpop.f32.mrb[8].mxu1 }
 0x293   :  { %v571_v62 = vadd.f32 %v2329_v61, %v3314_v30  ;;  %v562_v63 = vpop.f32.mrb[9].mxu1  ;;  %2389 = vmatprep.subr.bf16.mxu0 %v2635_v56 }
 0x294   :  { %v563_v1 = vadd.f32 %v3314_v30, %v562_v63  ;;  %v2330_v2 = vpop.f32.mrb[10].mxu1  ;;  %2355 = vmatprep.mubr.bf16.mxu0 %v611_v60 }
 0x295   :  { %v574_v3 = vadd.f32 %v2330_v2, %v3314_v30  ;;  %v565_v4 = vpop.f32.mrb[11].mxu1  ;;  %2356 = vmatmul.mubr.bf16.gmra.mrb[20].mxu0 %v612_v59  ;;  %v603_v6 = vmax.f32 %v571_v62, 0.0 }
 0x296   :  { %v566_v5 = vadd.f32 %v3314_v30, %v565_v4  ;;  %2390 = vmatpush3.bf16.msra.mxu0 %v2635_v56  ;;  %v601_v9 = vmax.f32 %v563_v1, 0.0 }
 0x297   :  { %v604_v7 = vmax.f32 %v574_v3, 0.0  ;;  %2391 = vmatprep.subr.bf16.mxu0 %v2636_v0 }
 0x298   :  { %v602_v10 = vmax.f32 %v566_v5, 0.0 }
 0x299   :  { %v614_v11 = vpack.c.bf16 %v604_v7, %v603_v6 }
 0x29a   :  { %v613_v12 = vpack.c.bf16 %v602_v10, %v601_v9  ;;  %2392 = vmatpush3.bf16.msra.mxu0 %v2636_v0  ;;  %v2333_v13 = vpop.f32.mrb[12].mxu1 }
 0x29b   :  { %v587_v14 = vadd.f32 %v2333_v13, %v3314_v30  ;;  %v578_v15 = vpop.f32.mrb[13].mxu1  ;;  %2393 = vmatprep.subr.bf16.mxu0 %v2637_v8 }
 0x29c   :  { %v579_v17 = vadd.f32 %v3314_v30, %v578_v15  ;;  %v2334_v18 = vpop.f32.mrb[14].mxu1  ;;  %2359 = vmatprep.mubr.bf16.mxu0 %v613_v12 }
 0x29d   :  { %v590_v19 = vadd.f32 %v2334_v18, %v3314_v30  ;;  %v581_v20 = vpop.f32.mrb[15].mxu1  ;;  %2360 = vmatmul.mubr.bf16.gmra.mrb[24].mxu0 %v614_v11  ;;  %v607_v22 = vmax.f32 %v587_v14, 0.0 }
 0x29e   :  { %v582_v21 = vadd.f32 %v3314_v30, %v581_v20  ;;  %2394 = vmatpush3.bf16.msra.mxu0 %v2637_v8  ;;  %v605_v25 = vmax.f32 %v579_v17, 0.0  ;;  %v2640_v30 = vld [vmem:[%s3456_s10 + $0x38] sm:$0xff]  }
 0x29f   :  { %v608_v23 = vmax.f32 %v590_v19, 0.0  ;;  %2395 = vmatprep.subr.bf16.mxu0 %v2638_v16 }
 0x2a0   :  { %v606_v26 = vmax.f32 %v582_v21, 0.0 }
 0x2a1   :  { %v616_v28 = vpack.c.bf16 %v608_v23, %v607_v22  ;;  %v2641_v23 = vld [vmem:[#allocation14] sm:$0xff]  }
 0x2a2   :  { %v615_v29 = vpack.c.bf16 %v606_v26, %v605_v25  ;;  %2396 = vmatpush3.bf16.msra.mxu0 %v2638_v16  ;;  %v2371_v31 = vpop.f32.mrb[16].mxu1  ;;  %2417 = vmatprep.subr.bf16.mxu1 %v2641_v23  ;;  %v2643_v25 = vld [vmem:[#allocation14 + $0x10] sm:$0xff]   ;;  %v2644_v26 = vld [vmem:[#allocation14 + $0x18] sm:$0xff]  }
 0x2a3   :  { %v940_v32 = vadd.f32 %v2371_v31, %v3350_v27  ;;  %v931_v33 = vpop.f32.mrb[17].mxu1  ;;  %2397 = vmatprep.subr.bf16.mxu0 %v2639_v24  ;;  %2418 = vmatpush3.bf16.msra.mxu1 %v2641_v23  ;;  %v2648_v31 = vld [vmem:[#allocation14 + $0x38] sm:$0xff]  }
 0x2a4   :  { %v932_v34 = vadd.f32 %v3350_v27, %v931_v33  ;;  %2363 = vmatprep.mubr.bf16.mxu0 %v615_v29  ;;  %v2372_v35 = vpop.f32.mrb[18].mxu1  ;;  %v2647_v29 = vld [vmem:[#allocation14 + $0x30] sm:$0xff]   ;;  %v2650_v33 = vld [vmem:[#allocation17 + $0x8] sm:$0xff]  }
 0x2a5   :  { %v943_v36 = vadd.f32 %v2372_v35, %v3350_v27  ;;  %2364 = vmatmul.mubr.bf16.gmra.mrb[28].mxu0 %v616_v28  ;;  %v934_v37 = vpop.f32.mrb[19].mxu1  ;;  %v996_v39 = vmax.f32 %v940_v32, 0.0  ;;  %v2646_v28 = vld [vmem:[#allocation14 + $0x28] sm:$0xff]   ;;  %v2649_v32 = vld [vmem:[#allocation17] sm:$0xff]  }
 0x2a6   :  { %v935_v38 = vadd.f32 %v3350_v27, %v934_v37  ;;  %2398 = vmatpush3.bf16.msra.mxu0 %v2639_v24  ;;  %v994_v41 = vmax.f32 %v932_v34, 0.0  ;;  %v2642_v24 = vld [vmem:[#allocation14 + $0x8] sm:$0xff]   ;;  %v2652_v34 = vld [vmem:[#allocation17 + $0x18] sm:$0xff]   ;;  %v2653_v35 = vld [vmem:[#allocation17 + $0x20] sm:$0xff]  }
 0x2a7   :  { %v997_v40 = vmax.f32 %v943_v36, 0.0  ;;  %2399 = vmatprep.subr.bf16.mxu0 %v2640_v30  ;;  %2419 = vmatprep.subr.bf16.mxu1 %v2642_v24  ;;  %v2654_v36 = vld [vmem:[#allocation17 + $0x28] sm:$0xff]   ;;  %v2072_v37 = vld [vmem:[#allocation8] ss:$0 sm:$0xff] }
 0x2a8   :  { %v995_v42 = vmax.f32 %v935_v38, 0.0  ;;  %2420 = vmatpush3.bf16.msra.mxu1 %v2642_v24 }
 0x2a9   :  { %v1011_v43 = vpack.c.bf16 %v997_v40, %v996_v39  ;;  %2421 = vmatprep.subr.bf16.mxu1 %v2643_v25 }
 0x2aa   :  { %v1010_v44 = vpack.c.bf16 %v995_v42, %v994_v41  ;;  %2400 = vmatpush3.bf16.msra.mxu0 %v2640_v30  ;;  %v2375_v45 = vpop.f32.mrb[20].mxu1  ;;  %v2651_v30 = vld [vmem:[#allocation17 + $0x10] sm:$0xff]  }
 0x2ab   :  { %v956_v46 = vadd.f32 %v2375_v45, %v3350_v27  ;;  %v947_v47 = vpop.f32.mrb[21].mxu1  ;;  %2449 = vmatprep.subr.bf16.mxu0 %v2649_v32 }
 0x2ac   :  { %v948_v48 = vadd.f32 %v3350_v27, %v947_v47  ;;  %v2376_v49 = vpop.f32.mrb[22].mxu1  ;;  %2401 = vmatprep.mubr.bf16.mxu0 %v1010_v44  ;;  %2422 = vmatpush3.bf16.msra.mxu1 %v2643_v25 }
 0x2ad   :  { %v959_v50 = vadd.f32 %v2376_v49, %v3350_v27  ;;  %v950_v51 = vpop.f32.mrb[23].mxu1  ;;  %2402 = vmatmul.mubr.bf16.vlgmr.msra.gmra.mrb[32].mxu0 %v1011_v43  ;;  %v1000_v53 = vmax.f32 %v956_v46, 0.0  ;;  %2423 = vmatprep.subr.bf16.mxu1 %v2644_v26 }
 0x2ae   :  { %v951_v52 = vadd.f32 %v3350_v27, %v950_v51  ;;  %v998_v55 = vmax.f32 %v948_v48, 0.0  ;;  %2450 = vmatpush3.bf16.msra.mxu0 %v2649_v32 }
 0x2af   :  { %v1001_v54 = vmax.f32 %v959_v50, 0.0  ;;  %2451 = vmatprep.subr.bf16.mxu0 %v2650_v33 }
 0x2b0   :  { %v999_v56 = vmax.f32 %v951_v52, 0.0  ;;  %2424 = vmatpush3.bf16.msra.mxu1 %v2644_v26 }
 0x2b1   :  { %v1013_v57 = vpack.c.bf16 %v1001_v54, %v1000_v53 }
 0x2b2   :  { %v1012_v58 = vpack.c.bf16 %v999_v56, %v998_v55  ;;  %v2379_v59 = vpop.f32.mrb[24].mxu1  ;;  %2452 = vmatpush3.bf16.msra.mxu0 %v2650_v33 }
 0x2b3   :  { %v972_v60 = vadd.f32 %v2379_v59, %v3350_v27  ;;  %v963_v61 = vpop.f32.mrb[25].mxu1  ;;  %2453 = vmatprep.subr.bf16.mxu0 %v2651_v30 }
 0x2b4   :  { %v964_v62 = vadd.f32 %v3350_v27, %v963_v61  ;;  %v2380_v63 = vpop.f32.mrb[26].mxu1  ;;  %2405 = vmatprep.mubr.bf16.mxu0 %v1012_v58 }
 0x2b5   :  { %v975_v0 = vadd.f32 %v2380_v63, %v3350_v27  ;;  %v966_v1 = vpop.f32.mrb[27].mxu1  ;;  %2406 = vmatmul.mubr.bf16.gmra.mrb[36].mxu0 %v1013_v57  ;;  %v1004_v3 = vmax.f32 %v972_v60, 0.0 }
 0x2b6   :  { %v967_v2 = vadd.f32 %v3350_v27, %v966_v1  ;;  %v1002_v5 = vmax.f32 %v964_v62, 0.0  ;;  %2454 = vmatpush3.bf16.msra.mxu0 %v2651_v30 }
 0x2b7   :  { %v1005_v4 = vmax.f32 %v975_v0, 0.0  ;;  %2455 = vmatprep.subr.bf16.mxu0 %v2652_v34 }
 0x2b8   :  { %v1003_v6 = vmax.f32 %v967_v2, 0.0 }
 0x2b9   :  { %v1015_v7 = vpack.c.bf16 %v1005_v4, %v1004_v3 }
 0x2ba   :  { %v1014_v8 = vpack.c.bf16 %v1003_v6, %v1002_v5  ;;  %v2383_v9 = vpop.f32.mrb[28].mxu1  ;;  %2456 = vmatpush3.bf16.msra.mxu0 %v2652_v34 }
 0x2bb   :  { %v988_v10 = vadd.f32 %v2383_v9, %v3350_v27  ;;  %v979_v11 = vpop.f32.mrb[29].mxu1  ;;  %2457 = vmatprep.subr.bf16.mxu0 %v2653_v35 }
 0x2bc   :  { %v980_v12 = vadd.f32 %v3350_v27, %v979_v11  ;;  %v2384_v13 = vpop.f32.mrb[30].mxu1  ;;  %2409 = vmatprep.mubr.bf16.mxu0 %v1014_v8 }
 0x2bd   :  { %v991_v14 = vadd.f32 %v2384_v13, %v3350_v27  ;;  %v982_v15 = vpop.f32.mrb[31].mxu1  ;;  %2410 = vmatmul.mubr.bf16.gmra.mrb[40].mxu0 %v1015_v7  ;;  %v1008_v17 = vmax.f32 %v988_v10, 0.0 }
 0x2be   :  { %v983_v16 = vadd.f32 %v3350_v27, %v982_v15  ;;  %v1006_v19 = vmax.f32 %v980_v12, 0.0  ;;  %v2645_v27 = vld [vmem:[#allocation14 + $0x20] sm:$0xff]   ;;  %2458 = vmatpush3.bf16.msra.mxu0 %v2653_v35 }
 0x2bf   :  { %v1009_v18 = vmax.f32 %v991_v14, 0.0  ;;  %2425 = vmatprep.subr.bf16.mxu1 %v2645_v27  ;;  %2459 = vmatprep.subr.bf16.mxu0 %v2654_v36 }
 0x2c0   :  { %v1007_v20 = vmax.f32 %v983_v16, 0.0  ;;  %2426 = vmatpush3.bf16.msra.mxu1 %v2645_v27 }
 0x2c1   :  { %v1017_v21 = vpack.c.bf16 %v1009_v18, %v1008_v17  ;;  %2427 = vmatprep.subr.bf16.mxu1 %v2646_v28 }
 0x2c2   :  { %v1016_v22 = vpack.c.bf16 %v1007_v20, %v1006_v19  ;;  %2460 = vmatpush3.bf16.msra.mxu0 %v2654_v36 }
 0x2c4   :  { %2413 = vmatprep.mubr.bf16.mxu0 %v1016_v22  ;;  %2428 = vmatpush3.bf16.msra.mxu1 %v2646_v28  ;;  %v2099_v28 = vld [vmem:[#allocation12] ss:$0 sm:$0xff] }
 0x2c5   :  { %2414 = vmatmul.mubr.bf16.gmra.mrb[44].mxu0 %v1017_v21  ;;  %2429 = vmatprep.subr.bf16.mxu1 %v2647_v29 }
 0x2c8   :  { %2430 = vmatpush3.bf16.msra.mxu1 %v2647_v29 }
 0x2c9   :  { %2431 = vmatprep.subr.bf16.mxu1 %v2648_v31 }
 0x2cc   :  { %2432 = vmatpush3.bf16.msra.mxu1 %v2648_v31 }
 0x360   :  { %v2353_v38 = vpop.f32.mrb[16].mxu0 }
 0x361   :  { %v731_v39 = vadd.f32 %v2353_v38, %v2072_v37  ;;  %v722_v40 = vpop.f32.mrb[17].mxu0 }
 0x362   :  { %v723_v41 = vadd.f32 %v2072_v37, %v722_v40  ;;  %v2354_v42 = vpop.f32.mrb[18].mxu0 }
 0x363   :  { %v734_v43 = vadd.f32 %v2354_v42, %v2072_v37  ;;  %v725_v44 = vpop.f32.mrb[19].mxu0  ;;  %v787_v46 = vmax.f32 %v731_v39, 0.0 }
 0x364   :  { %v726_v45 = vadd.f32 %v2072_v37, %v725_v44  ;;  %v785_v48 = vmax.f32 %v723_v41, 0.0 }
 0x365   :  { %v788_v47 = vmax.f32 %v734_v43, 0.0 }
 0x366   :  { %v786_v49 = vmax.f32 %v726_v45, 0.0 }
 0x367   :  { %v3371_v50 = vpack.c.bf16 %v788_v47, %v787_v46 }
 0x368   :  { %v3373_v51 = vpack.c.bf16 %v786_v49, %v785_v48  ;;  %v2357_v52 = vpop.f32.mrb[20].mxu0 }
 0x369   :  { %v747_v53 = vadd.f32 %v2357_v52, %v2072_v37  ;;  %v738_v54 = vpop.f32.mrb[21].mxu0 }
 0x36a   :  { %v739_v55 = vadd.f32 %v2072_v37, %v738_v54  ;;  %v2358_v56 = vpop.f32.mrb[22].mxu0 }
 0x36b   :  { %v750_v57 = vadd.f32 %v2358_v56, %v2072_v37  ;;  %v741_v58 = vpop.f32.mrb[23].mxu0  ;;  %v791_v60 = vmax.f32 %v747_v53, 0.0 }
 0x36c   :  { %v742_v59 = vadd.f32 %v2072_v37, %v741_v58  ;;  %v789_v62 = vmax.f32 %v739_v55, 0.0 }
 0x36d   :  { %v792_v61 = vmax.f32 %v750_v57, 0.0 }
 0x36e   :  { %v790_v63 = vmax.f32 %v742_v59, 0.0 }
 0x36f   :  { %v3375_v0 = vpack.c.bf16 %v792_v61, %v791_v60 }
 0x370   :  { %v3377_v1 = vpack.c.bf16 %v790_v63, %v789_v62  ;;  %v2361_v2 = vpop.f32.mrb[24].mxu0 }
 0x371   :  { %v763_v3 = vadd.f32 %v2361_v2, %v2072_v37  ;;  %v754_v4 = vpop.f32.mrb[25].mxu0 }
 0x372   :  { %v755_v5 = vadd.f32 %v2072_v37, %v754_v4  ;;  %v2362_v6 = vpop.f32.mrb[26].mxu0 }
 0x373   :  { %v766_v7 = vadd.f32 %v2362_v6, %v2072_v37  ;;  %v757_v8 = vpop.f32.mrb[27].mxu0  ;;  %v795_v10 = vmax.f32 %v763_v3, 0.0 }
 0x374   :  { %v758_v9 = vadd.f32 %v2072_v37, %v757_v8  ;;  %v793_v12 = vmax.f32 %v755_v5, 0.0 }
 0x375   :  { %v796_v11 = vmax.f32 %v766_v7, 0.0 }
 0x376   :  { %v794_v13 = vmax.f32 %v758_v9, 0.0 }
 0x377   :  { %v3379_v14 = vpack.c.bf16 %v796_v11, %v795_v10 }
 0x378   :  { %v3381_v15 = vpack.c.bf16 %v794_v13, %v793_v12  ;;  %v2365_v16 = vpop.f32.mrb[28].mxu0 }
 0x379   :  { %v779_v17 = vadd.f32 %v2365_v16, %v2072_v37  ;;  %v770_v18 = vpop.f32.mrb[29].mxu0 }
 0x37a   :  { %v771_v19 = vadd.f32 %v2072_v37, %v770_v18  ;;  %v2366_v20 = vpop.f32.mrb[30].mxu0 }
 0x37b   :  { %v782_v21 = vadd.f32 %v2366_v20, %v2072_v37  ;;  %v773_v22 = vpop.f32.mrb[31].mxu0  ;;  %v799_v24 = vmax.f32 %v779_v17, 0.0 }
 0x37c   :  { %v774_v23 = vadd.f32 %v2072_v37, %v773_v22  ;;  %v797_v26 = vmax.f32 %v771_v19, 0.0 }
 0x37d   :  { %v800_v25 = vmax.f32 %v782_v21, 0.0 }
 0x37e   :  { %v798_v27 = vmax.f32 %v774_v23, 0.0 }
 0x37f   :  { %v3383_v29 = vpack.c.bf16 %v800_v25, %v799_v24 }
 0x380   :  { %v3385_v31 = vpack.c.bf16 %v798_v27, %v797_v26  ;;  %v2403_v32 = vpop.f32.mrb[32].mxu0 }
 0x381   :  { %v1132_v33 = vadd.f32 %v2403_v32, %v2099_v28  ;;  %v1123_v30 = vpop.f32.mrb[33].mxu0 }
 0x382   :  { %v1124_v34 = vadd.f32 %v2099_v28, %v1123_v30  ;;  %v2404_v35 = vpop.f32.mrb[34].mxu0  ;;  %v2656_v30 = vld [vmem:[#allocation17 + $0x38] sm:$0xff]  }
 0x383   :  { %v1135_v36 = vadd.f32 %v2404_v35, %v2099_v28  ;;  %v1126_v38 = vpop.f32.mrb[35].mxu0  ;;  %v1188_v40 = vmax.f32 %v1132_v33, 0.0  ;;  %v2655_v33 = vld [vmem:[#allocation17 + $0x30] sm:$0xff]   ;;  %v2665_v35 = vld [vmem:[#allocation18] sm:$0xff]  }
 0x384   :  { %v1127_v39 = vadd.f32 %v2099_v28, %v1126_v38  ;;  %v1186_v37 = vmax.f32 %v1124_v34, 0.0  ;;  %2461 = vmatprep.subr.bf16.mxu0 %v2655_v33  ;;  %v2657_v34 = vld [vmem:[#allocation15] sm:$0xff]   ;;  %2513 = vmatprep.subr.bf16.mxu1 %v2665_v35  ;;  %v2668_v38 = vld [vmem:[#allocation18 + $0x18] sm:$0xff]  }
 0x385   :  { %v1189_v41 = vmax.f32 %v1135_v36, 0.0  ;;  %2462 = vmatpush3.bf16.msra.mxu0 %v2655_v33  ;;  %v2666_v36 = vld [vmem:[#allocation18 + $0x8] sm:$0xff]  }
 0x386   :  { %v1187_v42 = vmax.f32 %v1127_v39, 0.0  ;;  %2463 = vmatprep.subr.bf16.mxu0 %v2656_v30  ;;  %v2669_v39 = vld [vmem:[#allocation18 + $0x20] sm:$0xff]  }
 0x387   :  { %v1203_v43 = vpack.c.bf16 %v1189_v41, %v1188_v40  ;;  %v2670_v40 = vld [vmem:[#allocation18 + $0x28] sm:$0xff]   ;;  %v3390_v41 = vld [vmem:[%s3459_s13] ss:$0 sm:$0xff] }
 0x388   :  { %v1202_v44 = vpack.c.bf16 %v1187_v42, %v1186_v37  ;;  %v2407_v45 = vpop.f32.mrb[36].mxu0 }
 0x389   :  { %v1148_v46 = vadd.f32 %v2407_v45, %v2099_v28  ;;  %v1139_v47 = vpop.f32.mrb[37].mxu0  ;;  %2464 = vmatpush3.bf16.msra.mxu0 %v2656_v30 }
 0x38a   :  { %v1140_v48 = vadd.f32 %v2099_v28, %v1139_v47  ;;  %v2408_v49 = vpop.f32.mrb[38].mxu0  ;;  %2433 = vmatprep.mubr.bf16.mxu1 %v1202_v44  ;;  %2481 = vmatprep.subr.bf16.mxu0 %v2657_v34 }
 0x38b   :  { %v1151_v52 = vadd.f32 %v2408_v49, %v2099_v28  ;;  %v1142_v53 = vpop.f32.mrb[39].mxu0  ;;  %2434 = vmatmul.mubr.bf16.vlgmr.msra.gmra.mrb[32].mxu1 %v1203_v43  ;;  %v1192_v55 = vmax.f32 %v1148_v46, 0.0 }
 0x38c   :  { %v1143_v54 = vadd.f32 %v2099_v28, %v1142_v53  ;;  %v1190_v57 = vmax.f32 %v1140_v48, 0.0  ;;  %2514 = vmatpush3.bf16.msra.mxu1 %v2665_v35  ;;  %v2662_v35 = vld [vmem:[#allocation15 + $0x28] sm:$0xff]  }
 0x38d   :  { %v1193_v56 = vmax.f32 %v1151_v52, 0.0  ;;  %2515 = vmatprep.subr.bf16.mxu1 %v2666_v36 }
 0x38e   :  { %v1191_v58 = vmax.f32 %v1143_v54, 0.0 }
 0x38f   :  { %v1205_v59 = vpack.c.bf16 %v1193_v56, %v1192_v55 }
 0x390   :  { %v1204_v60 = vpack.c.bf16 %v1191_v58, %v1190_v57  ;;  %v2411_v61 = vpop.f32.mrb[40].mxu0  ;;  %2516 = vmatpush3.bf16.msra.mxu1 %v2666_v36 }
 0x391   :  { %v1164_v62 = vadd.f32 %v2411_v61, %v2099_v28  ;;  %v1155_v63 = vpop.f32.mrb[41].mxu0 }
 0x392   :  { %v1156_v2 = vadd.f32 %v2099_v28, %v1155_v63  ;;  %v2412_v3 = vpop.f32.mrb[42].mxu0  ;;  %2437 = vmatprep.mubr.bf16.mxu1 %v1204_v60  ;;  %v2658_v60 = vld [vmem:[#allocation15 + $0x8] sm:$0xff]  }
 0x393   :  { %v1167_v4 = vadd.f32 %v2412_v3, %v2099_v28  ;;  %v1158_v5 = vpop.f32.mrb[43].mxu0  ;;  %2438 = vmatmul.mubr.bf16.gmra.mrb[36].mxu1 %v1205_v59  ;;  %v1196_v7 = vmax.f32 %v1164_v62, 0.0 }
 0x394   :  { %v1159_v6 = vadd.f32 %v2099_v28, %v1158_v5  ;;  %v1194_v9 = vmax.f32 %v1156_v2, 0.0 }
 0x395   :  { %v1197_v8 = vmax.f32 %v1167_v4, 0.0 }
 0x396   :  { %v1195_v10 = vmax.f32 %v1159_v6, 0.0  ;;  %v2659_v6 = vld [vmem:[#allocation15 + $0x10] sm:$0xff]  }
 0x397   :  { %v1207_v11 = vpack.c.bf16 %v1197_v8, %v1196_v7 }
 0x398   :  { %v1206_v12 = vpack.c.bf16 %v1195_v10, %v1194_v9  ;;  %v2415_v13 = vpop.f32.mrb[44].mxu0 }
 0x399   :  { %v1180_v16 = vadd.f32 %v2415_v13, %v2099_v28  ;;  %v1171_v17 = vpop.f32.mrb[45].mxu0 }
 0x39a   :  { %v1172_v18 = vadd.f32 %v2099_v28, %v1171_v17  ;;  %v2416_v19 = vpop.f32.mrb[46].mxu0  ;;  %2441 = vmatprep.mubr.bf16.mxu1 %v1206_v12 }
 0x39b   :  { %v1183_v20 = vadd.f32 %v2416_v19, %v2099_v28  ;;  %v1174_v21 = vpop.f32.mrb[47].mxu0  ;;  %2442 = vmatmul.mubr.bf16.gmra.mrb[40].mxu1 %v1207_v11  ;;  %v1200_v23 = vmax.f32 %v1180_v16, 0.0  ;;  %v2660_v16 = vld [vmem:[#allocation15 + $0x18] sm:$0xff]  }
 0x39c   :  { %v1175_v22 = vadd.f32 %v2099_v28, %v1174_v21  ;;  %v1198_v25 = vmax.f32 %v1172_v18, 0.0  ;;  %v2667_v28 = vld [vmem:[#allocation18 + $0x10] sm:$0xff]  }
 0x39d   :  { %v1201_v24 = vmax.f32 %v1183_v20, 0.0  ;;  %2517 = vmatprep.subr.bf16.mxu1 %v2667_v28 }
 0x39e   :  { %v1199_v26 = vmax.f32 %v1175_v22, 0.0  ;;  %2518 = vmatpush3.bf16.msra.mxu1 %v2667_v28 }
 0x39f   :  { %v1209_v27 = vpack.c.bf16 %v1201_v24, %v1200_v23  ;;  %2519 = vmatprep.subr.bf16.mxu1 %v2668_v38  ;;  %v2661_v24 = vld [vmem:[#allocation15 + $0x20] sm:$0xff]  }
 0x3a0   :  { %v1208_v32 = vpack.c.bf16 %v1199_v26, %v1198_v25 }
 0x3a2   :  { %2445 = vmatprep.mubr.bf16.mxu1 %v1208_v32  ;;  %2520 = vmatpush3.bf16.msra.mxu1 %v2668_v38 }
 0x3a3   :  { %2446 = vmatmul.mubr.bf16.gmra.mrb[44].mxu1 %v1209_v27  ;;  %2521 = vmatprep.subr.bf16.mxu1 %v2669_v39 }
 0x3a6   :  { %2522 = vmatpush3.bf16.msra.mxu1 %v2669_v39 }
 0x3a7   :  { %2523 = vmatprep.subr.bf16.mxu1 %v2670_v40 }
 0x3aa   :  { %2524 = vmatpush3.bf16.msra.mxu1 %v2670_v40 }
 0x45e   :  { %v2435_v37 = vpop.f32.mrb[32].mxu1 }
 0x45f   :  { %v1324_v42 = vadd.f32 %v2435_v37, %v3390_v41  ;;  %v1315_v43 = vpop.f32.mrb[33].mxu1 }
 0x460   :  { %v1316_v44 = vadd.f32 %v3390_v41, %v1315_v43  ;;  %v2436_v45 = vpop.f32.mrb[34].mxu1  ;;  %v2663_v43 = vld [vmem:[#allocation15 + $0x30] sm:$0xff]  }
 0x461   :  { %v1327_v46 = vadd.f32 %v2436_v45, %v3390_v41  ;;  %v1318_v47 = vpop.f32.mrb[35].mxu1  ;;  %v1380_v49 = vmax.f32 %v1324_v42, 0.0 }
 0x462   :  { %v1319_v48 = vadd.f32 %v3390_v41, %v1318_v47  ;;  %v1378_v53 = vmax.f32 %v1316_v44, 0.0 }
 0x463   :  { %v1381_v52 = vmax.f32 %v1327_v46, 0.0 }
 0x464   :  { %v1379_v54 = vmax.f32 %v1319_v48, 0.0  ;;  %v2664_v48 = vld [vmem:[#allocation15 + $0x38] sm:$0xff]  }
 0x465   :  { %v1419_v55 = vpack.c.bf16 %v1381_v52, %v1380_v49 }
 0x466   :  { %v1418_v56 = vpack.c.bf16 %v1379_v54, %v1378_v53  ;;  %v2439_v57 = vpop.f32.mrb[36].mxu1 }
 0x467   :  { %v1340_v58 = vadd.f32 %v2439_v57, %v3390_v41  ;;  %v1331_v59 = vpop.f32.mrb[37].mxu1 }
 0x468   :  { %v1332_v61 = vadd.f32 %v3390_v41, %v1331_v59  ;;  %v2440_v62 = vpop.f32.mrb[38].mxu1  ;;  %2465 = vmatprep.mubr.bf16.mxu0 %v1418_v56 }
 0x469   :  { %v1343_v63 = vadd.f32 %v2440_v62, %v3390_v41  ;;  %v1334_v2 = vpop.f32.mrb[39].mxu1  ;;  %2466 = vmatmul.mubr.bf16.vlgmr.msra.gmra.mrb[48].mxu0 %v1419_v55  ;;  %v1384_v4 = vmax.f32 %v1340_v58, 0.0 }
 0x46a   :  { %v1335_v3 = vadd.f32 %v3390_v41, %v1334_v2  ;;  %2482 = vmatpush3.bf16.msra.mxu0 %v2657_v34  ;;  %v1382_v7 = vmax.f32 %v1332_v61, 0.0 }
 0x46b   :  { %v1385_v5 = vmax.f32 %v1343_v63, 0.0  ;;  %2483 = vmatprep.subr.bf16.mxu0 %v2658_v60 }
 0x46c   :  { %v1383_v8 = vmax.f32 %v1335_v3, 0.0 }
 0x46d   :  { %v1421_v9 = vpack.c.bf16 %v1385_v5, %v1384_v4 }
 0x46e   :  { %v1420_v10 = vpack.c.bf16 %v1383_v8, %v1382_v7  ;;  %2484 = vmatpush3.bf16.msra.mxu0 %v2658_v60  ;;  %v2443_v11 = vpop.f32.mrb[40].mxu1 }
 0x46f   :  { %v1356_v12 = vadd.f32 %v2443_v11, %v3390_v41  ;;  %v1347_v13 = vpop.f32.mrb[41].mxu1  ;;  %2485 = vmatprep.subr.bf16.mxu0 %v2659_v6 }
 0x470   :  { %v1348_v17 = vadd.f32 %v3390_v41, %v1347_v13  ;;  %v2444_v18 = vpop.f32.mrb[42].mxu1  ;;  %2469 = vmatprep.mubr.bf16.mxu0 %v1420_v10 }
 0x471   :  { %v1359_v19 = vadd.f32 %v2444_v18, %v3390_v41  ;;  %v1350_v20 = vpop.f32.mrb[43].mxu1  ;;  %2470 = vmatmul.mubr.bf16.gmra.mrb[52].mxu0 %v1421_v9  ;;  %v1388_v22 = vmax.f32 %v1356_v12, 0.0 }
 0x472   :  { %v1351_v21 = vadd.f32 %v3390_v41, %v1350_v20  ;;  %2486 = vmatpush3.bf16.msra.mxu0 %v2659_v6  ;;  %v1386_v25 = vmax.f32 %v1348_v17, 0.0 }
 0x473   :  { %v1389_v23 = vmax.f32 %v1359_v19, 0.0  ;;  %2487 = vmatprep.subr.bf16.mxu0 %v2660_v16 }
 0x474   :  { %v1387_v26 = vmax.f32 %v1351_v21, 0.0 }
 0x475   :  { %v1423_v27 = vpack.c.bf16 %v1389_v23, %v1388_v22 }
 0x476   :  { %v1422_v32 = vpack.c.bf16 %v1387_v26, %v1386_v25  ;;  %2488 = vmatpush3.bf16.msra.mxu0 %v2660_v16  ;;  %v2447_v33 = vpop.f32.mrb[44].mxu1 }
 0x477   :  { %v1372_v30 = vadd.f32 %v2447_v33, %v3390_v41  ;;  %v1363_v34 = vpop.f32.mrb[45].mxu1  ;;  %2489 = vmatprep.subr.bf16.mxu0 %v2661_v24 }
 0x478   :  { %v1364_v36 = vadd.f32 %v3390_v41, %v1363_v34  ;;  %v2448_v28 = vpop.f32.mrb[46].mxu1  ;;  %2473 = vmatprep.mubr.bf16.mxu0 %v1422_v32 }
 0x479   :  { %v1375_v38 = vadd.f32 %v2448_v28, %v3390_v41  ;;  %v1366_v39 = vpop.f32.mrb[47].mxu1  ;;  %2474 = vmatmul.mubr.bf16.gmra.mrb[56].mxu0 %v1423_v27  ;;  %v1392_v37 = vmax.f32 %v1372_v30, 0.0 }
 0x47a   :  { %v1367_v40 = vadd.f32 %v3390_v41, %v1366_v39  ;;  %2490 = vmatpush3.bf16.msra.mxu0 %v2661_v24  ;;  %v1390_v44 = vmax.f32 %v1364_v36, 0.0  ;;  %v2671_v41 = vld [vmem:[#allocation18 + $0x30] sm:$0xff]  }
 0x47b   :  { %v1393_v42 = vmax.f32 %v1375_v38, 0.0  ;;  %2491 = vmatprep.subr.bf16.mxu0 %v2662_v35  ;;  %2525 = vmatprep.subr.bf16.mxu1 %v2671_v41 }
 0x47c   :  { %v1391_v45 = vmax.f32 %v1367_v40, 0.0  ;;  %2526 = vmatpush3.bf16.msra.mxu1 %v2671_v41 }
 0x47d   :  { %v1425_v46 = vpack.c.bf16 %v1393_v42, %v1392_v37 }
 0x47e   :  { %v1424_v47 = vpack.c.bf16 %v1391_v45, %v1390_v44  ;;  %2492 = vmatpush3.bf16.msra.mxu0 %v2662_v35  ;;  %v2941_v44 = vmov 0.0   ;;  %v2012_v45 = vld [vmem:[#allocation2] sm:$0x1] }
 0x47f   :  { %2493 = vmatprep.subr.bf16.mxu0 %v2663_v43 }
 0x480   :  { %2477 = vmatprep.mubr.bf16.mxu0 %v1424_v47  ;;  %v2134_v47 = vld [vmem:[%s3464_s18] ss:$0 sm:$0xff] }
 0x481   :  { %2478 = vmatmul.mubr.bf16.gmra.mrb[60].mxu0 %v1425_v46  ;;  %v2943_v46 = vmov 0  }
 0x482   :  { %2494 = vmatpush3.bf16.msra.mxu0 %v2663_v43  ;;  %2497 = vmatprep.mubr.bf16.mxu0 %v3373_v51  ;;  %v2672_v51 = vld [vmem:[#allocation18 + $0x38] sm:$0xff]  }
 0x483   :  { %2495 = vmatprep.subr.bf16.mxu0 %v2664_v48  ;;  %2527 = vmatprep.subr.bf16.mxu1 %v2672_v51 }
 0x484   :  { %2528 = vmatpush3.bf16.msra.mxu1 %v2672_v51  ;;  %2597 = vset.pattern.permute.xlu0 %v2943_v46 }
 0x485   :  { %2545 = vmatprep.subr.bf16.mxu1 %v2941_v44  ;;  %2015 = vperm.xlu0 %2597, %v2012_v45  }
 0x486   :  { %2496 = vmatpush3.bf16.msra.mxu0 %v2664_v48 }
 0x489   :  { %2498 = vmatmul.mubr.bf16.vlgmr.msra.gmra.mrb[48].mxu0 %v3371_v50  ;;  %v2133_v50 = vld [vmem:[%s3462_s16] ss:$0 sm:$0xff] }
 0x48a   :  { %2501 = vmatprep.mubr.bf16.mxu0 %v3377_v1 }
 0x491   :  { %2502 = vmatmul.mubr.bf16.gmra.mrb[52].mxu0 %v3375_v0 }
 0x492   :  { %2505 = vmatprep.mubr.bf16.mxu0 %v3381_v15 }
 0x499   :  { %2506 = vmatmul.mubr.bf16.gmra.mrb[56].mxu0 %v3379_v14 }
 0x49a   :  { %2509 = vmatprep.mubr.bf16.mxu0 %v3385_v31 }
 0x4a1   :  { %2510 = vmatmul.mubr.bf16.gmra.mrb[60].mxu0 %v3383_v29 }
 0x504   :  { %v2016_v45 = vpop.permute.xlu0 %2015 }
 0x55c   :  { %v2499_v1 = vpop.f32.mrb[48].mxu0 }
 0x55d   :  { %v1741_v0 = vadd.f32 %v2499_v1, %v2133_v50  ;;  %v1669_v49 = vpop.f32.mrb[49].mxu0 }
 0x55e   :  { %v1739_v15 = vadd.f32 %v2133_v50, %v1669_v49  ;;  %v2500_v52 = vpop.f32.mrb[50].mxu0 }
 0x55f   :  { %v1742_v14 = vadd.f32 %v2500_v52, %v2133_v50  ;;  %v1672_v53 = vpop.f32.mrb[51].mxu0  ;;  %v1757_v54 = vmax.f32 %v1741_v0, 0.0 }
 0x560   :  { %v1740_v31 = vadd.f32 %v2133_v50, %v1672_v53  ;;  %v1755_v55 = vmax.f32 %v1739_v15, 0.0 }
 0x561   :  { %v1758_v29 = vmax.f32 %v1742_v14, 0.0 }
 0x562   :  { %v1756_v56 = vmax.f32 %v1740_v31, 0.0 }
 0x563   :  { %v1772_v57 = vpack.c.bf16 %v1758_v29, %v1757_v54 }
 0x564   :  { %v1771_v58 = vpack.c.bf16 %v1756_v56, %v1755_v55  ;;  %v2503_v59 = vpop.f32.mrb[52].mxu0 }
 0x565   :  { %v1745_v60 = vadd.f32 %v2503_v59, %v2133_v50  ;;  %v1685_v61 = vpop.f32.mrb[53].mxu0 }
 0x566   :  { %v1743_v62 = vadd.f32 %v2133_v50, %v1685_v61  ;;  %v2504_v63 = vpop.f32.mrb[54].mxu0  ;;  %2529 = vmatprep.mubr.bf16.mxu1 %v1771_v58 }
 0x567   :  { %v1746_v2 = vadd.f32 %v2504_v63, %v2133_v50  ;;  %v1688_v3 = vpop.f32.mrb[55].mxu0  ;;  %2530 = vmatmul.mubr.bf16.vlgmr.msra.gmra.mrb[48].mxu1 %v1772_v57  ;;  %v1761_v5 = vmax.f32 %v1745_v60, 0.0 }
 0x568   :  { %v1744_v4 = vadd.f32 %v2133_v50, %v1688_v3  ;;  %v1759_v7 = vmax.f32 %v1743_v62, 0.0 }
 0x569   :  { %v1762_v6 = vmax.f32 %v1746_v2, 0.0 }
 0x56a   :  { %v1760_v8 = vmax.f32 %v1744_v4, 0.0 }
 0x56b   :  { %v1774_v9 = vpack.c.bf16 %v1762_v6, %v1761_v5 }
 0x56c   :  { %v1773_v10 = vpack.c.bf16 %v1760_v8, %v1759_v7  ;;  %v2507_v11 = vpop.f32.mrb[56].mxu0 }
 0x56d   :  { %v1749_v12 = vadd.f32 %v2507_v11, %v2133_v50  ;;  %v1701_v13 = vpop.f32.mrb[57].mxu0 }
 0x56e   :  { %v1747_v16 = vadd.f32 %v2133_v50, %v1701_v13  ;;  %v2508_v17 = vpop.f32.mrb[58].mxu0  ;;  %2533 = vmatprep.mubr.bf16.mxu1 %v1773_v10 }
 0x56f   :  { %v1750_v18 = vadd.f32 %v2508_v17, %v2133_v50  ;;  %v1704_v19 = vpop.f32.mrb[59].mxu0  ;;  %2534 = vmatmul.mubr.bf16.gmra.mrb[52].mxu1 %v1774_v9  ;;  %v1765_v21 = vmax.f32 %v1749_v12, 0.0 }
 0x570   :  { %v1748_v20 = vadd.f32 %v2133_v50, %v1704_v19  ;;  %v1763_v23 = vmax.f32 %v1747_v16, 0.0 }
 0x571   :  { %v1766_v22 = vmax.f32 %v1750_v18, 0.0 }
 0x572   :  { %v1764_v24 = vmax.f32 %v1748_v20, 0.0 }
 0x573   :  { %v1776_v25 = vpack.c.bf16 %v1766_v22, %v1765_v21 }
 0x574   :  { %v1775_v26 = vpack.c.bf16 %v1764_v24, %v1763_v23  ;;  %v2511_v27 = vpop.f32.mrb[60].mxu0 }
 0x575   :  { %v1753_v32 = vadd.f32 %v2511_v27, %v2133_v50  ;;  %v1717_v33 = vpop.f32.mrb[61].mxu0 }
 0x576   :  { %v1751_v30 = vadd.f32 %v2133_v50, %v1717_v33  ;;  %v2512_v34 = vpop.f32.mrb[62].mxu0  ;;  %2537 = vmatprep.mubr.bf16.mxu1 %v1775_v26 }
 0x577   :  { %v1754_v35 = vadd.f32 %v2512_v34, %v2133_v50  ;;  %v1720_v36 = vpop.f32.mrb[63].mxu0  ;;  %2538 = vmatmul.mubr.bf16.gmra.mrb[56].mxu1 %v1776_v25  ;;  %v1769_v38 = vmax.f32 %v1753_v32, 0.0 }
 0x578   :  { %v1752_v28 = vadd.f32 %v2133_v50, %v1720_v36  ;;  %v1767_v40 = vmax.f32 %v1751_v30, 0.0 }
 0x579   :  { %v1770_v39 = vmax.f32 %v1754_v35, 0.0 }
 0x57a   :  { %v1768_v37 = vmax.f32 %v1752_v28, 0.0 }
 0x57b   :  { %v1778_v42 = vpack.c.bf16 %v1770_v39, %v1769_v38 }
 0x57c   :  { %v1777_v43 = vpack.c.bf16 %v1768_v37, %v1767_v40  ;;  %v1963_v40 = vld [vmem:[%s3465_s19] sm:$0xf]  ;;  %v2018_v37 = vlaneseq }
 0x57e   :  { %2541 = vmatprep.mubr.bf16.mxu1 %v1777_v43 }
 0x57f   :  { %2542 = vmatmul.mubr.bf16.gmra.mrb[60].mxu1 %v1778_v42  ;;  %v2019_v42 = vshrl.u32 %v2018_v37, 7 }
 0x580   :  { %2561 = vmatprep.mubr.msk.bf16.mxu1 %vm2942_vm2, %v2941_v44 }
 0x581   :  { %v2020_v43 = vsub.s32 0, %v2019_v42 }
 0x583   :  { %v2021_v46 = vrot.slane %v2016_v45, %v2020_v43 }
 0x63a   :  { %v2531_v48 = vpop.f32.mrb[48].mxu1 }
 0x63b   :  { %v1893_v41 = vadd.f32 %v2531_v48, %v2134_v47  ;;  %v1884_v51 = vpop.f32.mrb[49].mxu1 }
 0x63c   :  { %v1885_v50 = vadd.f32 %v2134_v47, %v1884_v51  ;;  %v2532_v1 = vpop.f32.mrb[50].mxu1 }
 0x63d   :  { %v1896_v0 = vadd.f32 %v2532_v1, %v2134_v47  ;;  %v1887_v49 = vpop.f32.mrb[51].mxu1  ;;  %v1949_v52 = vmax.f32 %v1893_v41, 0.0 }
 0x63e   :  { %v1888_v15 = vadd.f32 %v2134_v47, %v1887_v49  ;;  %v1947_v53 = vmax.f32 %v1885_v50, 0.0 }
 0x63f   :  { %v1950_v14 = vmax.f32 %v1896_v0, 0.0 }
 0x640   :  { %v1948_v31 = vmax.f32 %v1888_v15, 0.0 }
 0x641   :  { %v1965_v54 = vpack.c.bf16 %v1950_v14, %v1949_v52 }
 0x642   :  { %v1964_v29 = vpack.c.bf16 %v1948_v31, %v1947_v53  ;;  %v2535_v55 = vpop.f32.mrb[52].mxu1 }
 0x643   :  { %v1909_v56 = vadd.f32 %v2535_v55, %v2134_v47  ;;  %v1900_v57 = vpop.f32.mrb[53].mxu1 }
 0x644   :  { %v1901_v58 = vadd.f32 %v2134_v47, %v1900_v57  ;;  %v2536_v59 = vpop.f32.mrb[54].mxu1  ;;  %2546 = vmatpush3.bf16.xpose.msra.mxu1 %v1964_v29 }
 0x645   :  { %v1912_v60 = vadd.f32 %v2536_v59, %v2134_v47  ;;  %v1903_v61 = vpop.f32.mrb[55].mxu1  ;;  %2547 = vmatprep.subr.bf16.mxu1 %v2941_v44  ;;  %v1953_v63 = vmax.f32 %v1909_v56, 0.0 }
 0x646   :  { %v1904_v62 = vadd.f32 %v2134_v47, %v1903_v61  ;;  %v1951_v3 = vmax.f32 %v1901_v58, 0.0 }
 0x647   :  { %v1954_v2 = vmax.f32 %v1912_v60, 0.0 }
 0x648   :  { %v1952_v4 = vmax.f32 %v1904_v62, 0.0 }
 0x649   :  { %v1967_v5 = vpack.c.bf16 %v1954_v2, %v1953_v63 }
 0x64a   :  { %v1966_v6 = vpack.c.bf16 %v1952_v4, %v1951_v3  ;;  %v2539_v7 = vpop.f32.mrb[56].mxu1 }
 0x64b   :  { %v1925_v8 = vadd.f32 %v2539_v7, %v2134_v47  ;;  %v1916_v9 = vpop.f32.mrb[57].mxu1 }
 0x64c   :  { %v1917_v10 = vadd.f32 %v2134_v47, %v1916_v9  ;;  %v2540_v11 = vpop.f32.mrb[58].mxu1  ;;  %2548 = vmatpush3.bf16.xpose.msra.mxu1 %v1965_v54 }
 0x64d   :  { %v1928_v12 = vadd.f32 %v2540_v11, %v2134_v47  ;;  %v1919_v13 = vpop.f32.mrb[59].mxu1  ;;  %2549 = vmatprep.subr.bf16.mxu1 %v2941_v44  ;;  %v1957_v17 = vmax.f32 %v1925_v8, 0.0 }
 0x64e   :  { %v1920_v16 = vadd.f32 %v2134_v47, %v1919_v13  ;;  %v1955_v19 = vmax.f32 %v1917_v10, 0.0 }
 0x64f   :  { %v1958_v18 = vmax.f32 %v1928_v12, 0.0 }
 0x650   :  { %v1956_v20 = vmax.f32 %v1920_v16, 0.0 }
 0x651   :  { %v1969_v21 = vpack.c.bf16 %v1958_v18, %v1957_v17 }
 0x652   :  { %v1968_v22 = vpack.c.bf16 %v1956_v20, %v1955_v19  ;;  %v2543_v23 = vpop.f32.mrb[60].mxu1 }
 0x653   :  { %v1941_v24 = vadd.f32 %v2543_v23, %v2134_v47  ;;  %v1932_v25 = vpop.f32.mrb[61].mxu1 }
 0x654   :  { %v1933_v26 = vadd.f32 %v2134_v47, %v1932_v25  ;;  %v2544_v27 = vpop.f32.mrb[62].mxu1  ;;  %2550 = vmatpush3.bf16.xpose.msra.mxu1 %v1966_v6 }
 0x655   :  { %v1944_v32 = vadd.f32 %v2544_v27, %v2134_v47  ;;  %v1935_v33 = vpop.f32.mrb[63].mxu1  ;;  %2551 = vmatprep.subr.bf16.mxu1 %v2941_v44  ;;  %v1961_v34 = vmax.f32 %v1941_v24, 0.0 }
 0x656   :  { %v1936_v30 = vadd.f32 %v2134_v47, %v1935_v33  ;;  %v1959_v36 = vmax.f32 %v1933_v26, 0.0 }
 0x657   :  { %v1962_v35 = vmax.f32 %v1944_v32, 0.0 }
 0x658   :  { %v1960_v28 = vmax.f32 %v1936_v30, 0.0 }
 0x659   :  { %v1971_v38 = vpack.c.bf16 %v1962_v35, %v1961_v34 }
 0x65a   :  { %v1970_v39 = vpack.c.bf16 %v1960_v28, %v1959_v36 }
 0x65c   :  { %2552 = vmatpush3.bf16.xpose.msra.mxu1 %v1967_v5 }
 0x65d   :  { %2553 = vmatprep.subr.bf16.mxu1 %v2941_v44 }
 0x664   :  { %2554 = vmatpush3.bf16.xpose.msra.mxu1 %v1968_v22 }
 0x665   :  { %2555 = vmatprep.subr.bf16.mxu1 %v2941_v44 }
 0x66c   :  { %2556 = vmatpush3.bf16.xpose.msra.mxu1 %v1969_v21 }
 0x66d   :  { %2557 = vmatprep.subr.bf16.mxu1 %v2941_v44 }
 0x674   :  { %2558 = vmatpush3.bf16.xpose.msra.mxu1 %v1970_v39 }
 0x675   :  { %2559 = vmatprep.subr.bf16.mxu1 %v2941_v44 }
 0x67c   :  { %2560 = vmatpush3.bf16.xpose.msra.mxu1 %v1971_v38 }
 0x683   :  { %2562 = vmatmul.mubr.bf16.vlgmr.msra.gmra.mrb[64].mxu1 %v1963_v40 }
 0x756   :  { %v2006_v47 = vpop.f32.mrb[64].mxu1 }
 0x757   :  { %v2022_v48 = vadd.f32 %v2021_v46, %v2006_v47  ;;  %v2563_v41 = vpop.f32.mrb[65].mxu1 }
 0x758   :  { %v2009_v51 = vpop.f32.mrb[66].mxu1 }
 0x759   :  { %2023 = vst [vmem:[#allocation20] sm:$0x1] %v2022_v48  ;;  %v2564_v44 = vpop.f32.mrb[67].mxu1 }
 0x75a   :  { %2904 = shalt.err (!%p2901_p0)
}
 0x75b   :  { %s2905_s15 = scalar_lea.hbm %s3467_s21, 16 }
 0x75c   :  { %p2906_p1 = scmp.ne.s32.totalorder %s3467_s21, %s2905_s15  ;;  %p2909_p2 = scmp.lt.u32.totalorder %s2905_s15, %s3467_s21 }
 0x75e   :  { %p2911_p3 = pnand %p2909_p2, %p2906_p1 }
 0x760   :  { %2914 = shalt.err (!%p2911_p3)
}
 0x761   :  { %2033 = dma.vmem_to_hbm [thread:$0]  %s2031_s9, 16, %s3467_s21, [#allocation5]  }
 0x762   :  { %2927 = dma.done.wait [#allocation5], 16  }
 0x763   :  { %2928 = vsyncadd [#allocation5], 4294967280 }
 0x764   :  { %2037 = vsyncpa [#allocation4], 1 }
 0x765   :  { %2038 = vsyncpa [#allocation7], 1 }
 0x766   :  { %2039 = vsyncpa [#allocation10], 1 }
 0x767   :  { %2040 = vsyncpa [#allocation13], 1 }
 0x768   :  { %2041 = vsyncpa [#allocation16], 1 }
 0x769   :  { %2042 = vsyncpa [#allocation19], 1 }
 0x76a   :  { %2043 = vsyncpa [#allocation5], 1 }

</bundles_post_ra>
